<compile_context>
chip_gen: v6e
topology: v6e:2x2x1
jax: 0.10.0
libtpu: 0.0.40
codegen_flags: <defaults>
</compile_context>

<pallas_src>
import jax
import jax.numpy as jnp
from jax.experimental import pallas as pl
from jax.experimental.pallas import tpu as pltpu

_LANE = 128


def _round_up(n, m):
    return ((n + m - 1) // m) * m


def actor_kernel(x_ref, w1_ref, b1_ref, w2_ref, b2_ref, w3_ref, b3_ref, o_ref):
    # Cast x inside the kernel (VPU, hidden under the MXU) instead of a
    # separate wrapper-side XLA cast pass over HBM.
    x = x_ref[...].astype(w1_ref.dtype)
    # Layer 1: Linear + ReLU (MXU matmul, f32 accumulation; f32 epilogue on VPU).
    h1 = jnp.dot(x, w1_ref[...], preferred_element_type=jnp.float32)
    h1 = jnp.maximum(h1 + b1_ref[...], 0.0)
    # Layer 2: Linear + ReLU (dominant matmul, 512x384 padded).
    h2 = jnp.dot(h1.astype(w2_ref.dtype), w2_ref[...],
                 preferred_element_type=jnp.float32)
    h2 = jnp.maximum(h2 + b2_ref[...], 0.0)
    # Layer 3: Linear (true action_dim width) + Tanh (EUP), then *0.5 + 1.0.
    y = jnp.dot(h2.astype(w3_ref.dtype), w3_ref[...],
                preferred_element_type=jnp.float32)
    y = jnp.tanh(y + b3_ref[...])
    o_ref[...] = (y * 0.5 + 1.0).astype(o_ref.dtype)


def init_actor_params(key, state_dim, action_dim):
    """nn.Linear default init: U(-1/sqrt(fan_in), +1/sqrt(fan_in)).

    Weights are stored transposed vs. PyTorch, i.e. (in_features, out_features),
    so the kernel computes plain `x @ W + b`. Logical (unpadded) shapes.
    """
    dims = [(state_dim, 400), (400, 300), (300, action_dim)]
    params = {}
    for i, (fan_in, fan_out) in enumerate(dims, start=1):
        key, kw, kb = jax.random.split(key, 3)
        bound = 1.0 / jnp.sqrt(jnp.float32(fan_in))
        params[f"w{i}"] = jax.random.uniform(kw, (fan_in, fan_out), jnp.float32,
                                             minval=-bound, maxval=bound)
        params[f"b{i}"] = jax.random.uniform(kb, (1, fan_out), jnp.float32,
                                             minval=-bound, maxval=bound)
    return params


def pack_actor_params(params, compute_dtype=jnp.bfloat16):
    """Pad hidden dims (400->512, 300->384) to lane multiples; cast weights.

    Zero padding is exact: ReLU(0 + 0) = 0 and zero rows contribute nothing to
    the next matmul. The final output dim stays at the true action_dim so the
    kernel writes an unpadded (B, action_dim) result. Biases stay f32 (the
    post-matmul epilogue is kept in f32 vregs — works on v5e's f32-only VPU/EUP).
    bf16 weights/activations are the default on all generations (v5e/v6e/v7x
    MXUs are all bf16-native); pass compute_dtype=jnp.float32 for a strict path.
    """
    w1, b1, w2, b2, w3, b3 = (params[k] for k in ("w1", "b1", "w2", "b2", "w3", "b3"))
    s = w1.shape[0]
    h1, h2, a = w1.shape[1], w2.shape[1], w3.shape[1]
    h1p, h2p = _round_up(h1, _LANE), _round_up(h2, _LANE)

    def pad(m, rows, cols):
        return jnp.pad(m, ((0, rows - m.shape[0]), (0, cols - m.shape[1])))

    return {
        "w1": pad(w1, s, h1p).astype(compute_dtype),
        "b1": pad(b1, 1, h1p).astype(jnp.float32),
        "w2": pad(w2, h1p, h2p).astype(compute_dtype),
        "b2": pad(b2, 1, h2p).astype(jnp.float32),
        "w3": pad(w3, h2p, a).astype(compute_dtype),   # output dim unpadded
        "b3": b3.astype(jnp.float32),
    }


def _pick_bt(B, block_b):
    """Batch tile: one tile for small B, >= 2 grid steps once B is large.

    A block dim equal to the full array dim is always legal; otherwise keep it
    a multiple of 8 (sublane). Splitting into >= 2 steps lets ("parallel",)
    grid semantics shard across v7x's two TensorCores.
    """
    if B <= 256:
        return B
    return min(block_b, _round_up(pl.cdiv(B, 2), 8))


def _const_specs(arrays, single_buffer):
    """Constant-index BlockSpecs: weights/biases stay VMEM-resident across steps."""
    specs = []
    for a in arrays:
        idx = lambda i, _nd=a.ndim: (0,) * _nd
        if single_buffer:
            # Block index never changes -> no need for a second pipeline buffer.
            specs.append(pl.BlockSpec(a.shape, idx,
                                      pipeline_mode=pl.Buffered(buffer_count=1)))
        else:
            specs.append(pl.BlockSpec(a.shape, idx))
    return specs


def actor_forward(x, packed, *, block_b=1024):
    """x: (B, state_dim) f32 (passed untouched). packed: from pack_actor_params."""
    w1, b1, w2, b2, w3, b3 = (packed[k] for k in ("w1", "b1", "w2", "b2", "w3", "b3"))
    B, state_dim = x.shape
    action_dim = w3.shape[1]
    bt = _pick_bt(B, block_b)

    def run(single_buffer_weights):
        wspecs = _const_specs((w1, b1, w2, b2, w3, b3), single_buffer_weights)
        return pl.pallas_call(
            actor_kernel,
            out_shape=jax.ShapeDtypeStruct((B, action_dim), jnp.float32),
            grid=(pl.cdiv(B, bt),),
            in_specs=[
                pl.BlockSpec((bt, state_dim), lambda i: (i, 0)),   # batch-tiled x
                *wspecs,
            ],
            # Unpadded output block: last dim equals the full array dim (legal),
            # masked vst is fine — the MXU is the binding unit, not stores.
            out_specs=pl.BlockSpec((bt, action_dim), lambda i: (i, 0)),
            compiler_params=pltpu.CompilerParams(
                dimension_semantics=("parallel",)),   # 2-TC sharding on v7x
        )(x, w1, b1, w2, b2, w3, b3)

    try:
        return run(True)
    except Exception:
        # Fallback for jax versions where BlockSpec(pipeline_mode=pl.Buffered(1))
        # is unsupported: default double buffering of the small weight tiles.
        return run(False)


def actor_reference(x, params):
    h1 = jnp.maximum(x @ params["w1"] + params["b1"], 0.0)
    h2 = jnp.maximum(h1 @ params["w2"] + params["b2"], 0.0)
    return jnp.tanh(h2 @ params["w3"] + params["b3"]) * 0.5 + 1.0


if __name__ == "__main__":
    key = jax.random.PRNGKey(0)
    batch, state_dim, action_dim = 8, 32, 8

    kx, kp = jax.random.split(key)
    x = jax.random.normal(kx, (batch, state_dim), jnp.float32)
    params = init_actor_params(kp, state_dim, action_dim)
    ref = actor_reference(x, params)

    # Strict f32 path (validation).
    packed_f32 = pack_actor_params(params, compute_dtype=jnp.float32)
    out_f32 = jax.block_until_ready(actor_forward(x, packed_f32))
    assert out_f32.shape == (batch, action_dim)
    assert jnp.allclose(out_f32, ref, atol=1e-5, rtol=1e-5)

    # bf16-MXU path (default perf config on v5e/v6e/v7x): f32 accumulation +
    # f32 epilogue; weights and inter-layer activations quantized to bf16.
    packed_bf16 = pack_actor_params(params, compute_dtype=jnp.bfloat16)
    out_bf16 = jax.block_until_ready(actor_forward(x, packed_bf16))
    assert out_bf16.shape == (batch, action_dim)
    assert jnp.allclose(out_bf16, ref, atol=3e-2, rtol=3e-2)

    print("KERNEL_OK")
</pallas_src>

<mosaic_0001>
module attributes {stable_mosaic.version = 11 : i64} {
  func.func @actor_kernel(%arg0: i32, %arg1: memref<8x32xf32, #tpu.memory_space<vmem>>, %arg2: memref<32x512xf32, #tpu.memory_space<vmem>>, %arg3: memref<1x512xf32, #tpu.memory_space<vmem>>, %arg4: memref<512x384xf32, #tpu.memory_space<vmem>>, %arg5: memref<1x384xf32, #tpu.memory_space<vmem>>, %arg6: memref<384x8xf32, #tpu.memory_space<vmem>>, %arg7: memref<1x8xf32, #tpu.memory_space<vmem>>, %arg8: memref<8x8xf32, #tpu.memory_space<vmem>>) attributes {dimension_semantics = [#tpu.dimension_semantics<parallel>], iteration_bounds = array<i64: 1>, scalar_prefetch = 0 : i64, scratch_operands = 0 : i64, tpu.core_type = #tpu.core_type<tc>, window_params = [{transform_indices = @transform_0, window_bounds = array<i64: 8, 32>}, {pipeline_mode = #tpu.pipeline_mode<synchronous>, transform_indices = @transform_1, window_bounds = array<i64: 32, 512>}, {pipeline_mode = #tpu.pipeline_mode<synchronous>, transform_indices = @transform_2, window_bounds = array<i64: 1, 512>}, {pipeline_mode = #tpu.pipeline_mode<synchronous>, transform_indices = @transform_3, window_bounds = array<i64: 512, 384>}, {pipeline_mode = #tpu.pipeline_mode<synchronous>, transform_indices = @transform_4, window_bounds = array<i64: 1, 384>}, {pipeline_mode = #tpu.pipeline_mode<synchronous>, transform_indices = @transform_5, window_bounds = array<i64: 384, 8>}, {pipeline_mode = #tpu.pipeline_mode<synchronous>, transform_indices = @transform_6, window_bounds = array<i64: 1, 8>}, {transform_indices = @transform_7, window_bounds = array<i64: 8, 8>}]} {
    %c0 = arith.constant 0 : index
    %c0_0 = arith.constant 0 : index
    %0 = vector.load %arg1[%c0, %c0_0] : memref<8x32xf32, #tpu.memory_space<vmem>>, vector<8x32xf32>
    %c0_1 = arith.constant 0 : index
    %c0_2 = arith.constant 0 : index
    %1 = vector.load %arg2[%c0_1, %c0_2] : memref<32x512xf32, #tpu.memory_space<vmem>>, vector<32x512xf32>
    %cst = arith.constant dense<0.000000e+00> : vector<8x512xf32>
    %2 = tpu.matmul %0, %1, %cst {dimension_numbers = #tpu.dot_dimension_numbers<[1], [0], [0], [1], [0, 0, 1, 1], [], []>} : vector<8x32xf32>, vector<32x512xf32>, vector<8x512xf32> -> vector<8x512xf32>
    %c0_3 = arith.constant 0 : index
    %c0_4 = arith.constant 0 : index
    %3 = vector.load %arg3[%c0_3, %c0_4] : memref<1x512xf32, #tpu.memory_space<vmem>>, vector<1x512xf32>
    %4 = vector.broadcast %3 : vector<1x512xf32> to vector<8x512xf32>
    %5 = arith.addf %2, %4 : vector<8x512xf32>
    %cst_5 = arith.constant 0.000000e+00 : f32
    %6 = vector.broadcast %cst_5 : f32 to vector<8x512xf32>
    %7 = arith.maximumf %5, %6 : vector<8x512xf32>
    %c0_6 = arith.constant 0 : index
    %c0_7 = arith.constant 0 : index
    %8 = vector.load %arg4[%c0_6, %c0_7] : memref<512x384xf32, #tpu.memory_space<vmem>>, vector<512x384xf32>
    %cst_8 = arith.constant dense<0.000000e+00> : vector<8x384xf32>
    %9 = tpu.matmul %7, %8, %cst_8 {dimension_numbers = #tpu.dot_dimension_numbers<[1], [0], [0], [1], [0, 0, 1, 1], [], []>} : vector<8x512xf32>, vector<512x384xf32>, vector<8x384xf32> -> vector<8x384xf32>
    %c0_9 = arith.constant 0 : index
    %c0_10 = arith.constant 0 : index
    %10 = vector.load %arg5[%c0_9, %c0_10] : memref<1x384xf32, #tpu.memory_space<vmem>>, vector<1x384xf32>
    %11 = vector.broadcast %10 : vector<1x384xf32> to vector<8x384xf32>
    %12 = arith.addf %9, %11 : vector<8x384xf32>
    %cst_11 = arith.constant 0.000000e+00 : f32
    %13 = vector.broadcast %cst_11 : f32 to vector<8x384xf32>
    %14 = arith.maximumf %12, %13 : vector<8x384xf32>
    %c0_12 = arith.constant 0 : index
    %c0_13 = arith.constant 0 : index
    %15 = vector.load %arg6[%c0_12, %c0_13] : memref<384x8xf32, #tpu.memory_space<vmem>>, vector<384x8xf32>
    %cst_14 = arith.constant dense<0.000000e+00> : vector<8x8xf32>
    %16 = tpu.matmul %14, %15, %cst_14 {dimension_numbers = #tpu.dot_dimension_numbers<[1], [0], [0], [1], [0, 0, 1, 1], [], []>} : vector<8x384xf32>, vector<384x8xf32>, vector<8x8xf32> -> vector<8x8xf32>
    %c0_15 = arith.constant 0 : index
    %c0_16 = arith.constant 0 : index
    %17 = vector.load %arg7[%c0_15, %c0_16] : memref<1x8xf32, #tpu.memory_space<vmem>>, vector<1x8xf32>
    %18 = vector.broadcast %17 : vector<1x8xf32> to vector<8x8xf32>
    %19 = arith.addf %16, %18 : vector<8x8xf32>
    %20 = math.tanh %19 : vector<8x8xf32>
    %cst_17 = arith.constant 5.000000e-01 : f32
    %21 = vector.broadcast %cst_17 : f32 to vector<8x8xf32>
    %22 = arith.mulf %20, %21 : vector<8x8xf32>
    %cst_18 = arith.constant 1.000000e+00 : f32
    %23 = vector.broadcast %cst_18 : f32 to vector<8x8xf32>
    %24 = arith.addf %22, %23 : vector<8x8xf32>
    %c0_19 = arith.constant 0 : index
    %c0_20 = arith.constant 0 : index
    %25 = vector.load %arg8[%c0_19, %c0_20] : memref<8x8xf32, #tpu.memory_space<vmem>>, vector<8x8xf32>
    tpu.vector_store %arg8[%c0_19, %c0_20], %24 {strides = array<i32>} : memref<8x8xf32, #tpu.memory_space<vmem>>, vector<8x8xf32>,
    return
  }
  func.func @transform_0(%arg0: i32) -> (i32, i32) {
    %c0_i32 = arith.constant 0 : i32
    %c0_i32_0 = arith.constant 0 : i32
    return %arg0, %c0_i32 : i32, i32
  }
  func.func @transform_1(%arg0: i32) -> (i32, i32) {
    %c0_i32 = arith.constant 0 : i32
    %c0_i32_0 = arith.constant 0 : i32
    %c0_i32_1 = arith.constant 0 : i32
    return %c0_i32, %c0_i32_0 : i32, i32
  }
  func.func @transform_2(%arg0: i32) -> (i32, i32) {
    %c0_i32 = arith.constant 0 : i32
    %c0_i32_0 = arith.constant 0 : i32
    %c0_i32_1 = arith.constant 0 : i32
    return %c0_i32, %c0_i32_0 : i32, i32
  }
  func.func @transform_3(%arg0: i32) -> (i32, i32) {
    %c0_i32 = arith.constant 0 : i32
    %c0_i32_0 = arith.constant 0 : i32
    %c0_i32_1 = arith.constant 0 : i32
    return %c0_i32, %c0_i32_0 : i32, i32
  }
  func.func @transform_4(%arg0: i32) -> (i32, i32) {
    %c0_i32 = arith.constant 0 : i32
    %c0_i32_0 = arith.constant 0 : i32
    %c0_i32_1 = arith.constant 0 : i32
    return %c0_i32, %c0_i32_0 : i32, i32
  }
  func.func @transform_5(%arg0: i32) -> (i32, i32) {
    %c0_i32 = arith.constant 0 : i32
    %c0_i32_0 = arith.constant 0 : i32
    %c0_i32_1 = arith.constant 0 : i32
    return %c0_i32, %c0_i32_0 : i32, i32
  }
  func.func @transform_6(%arg0: i32) -> (i32, i32) {
    %c0_i32 = arith.constant 0 : i32
    %c0_i32_0 = arith.constant 0 : i32
    %c0_i32_1 = arith.constant 0 : i32
    return %c0_i32, %c0_i32_0 : i32, i32
  }
  func.func @transform_7(%arg0: i32) -> (i32, i32) {
    %c0_i32 = arith.constant 0 : i32
    %c0_i32_0 = arith.constant 0 : i32
    return %arg0, %c0_i32 : i32, i32
  }
}

module attributes {stable_mosaic.version = 11 : i64} {
  func.func @actor_kernel(%arg0: i32, %arg1: memref<8x32xf32, #tpu.memory_space<vmem>>, %arg2: memref<32x512xf32, #tpu.memory_space<vmem>>, %arg3: memref<1x512xf32, #tpu.memory_space<vmem>>, %arg4: memref<512x384xf32, #tpu.memory_space<vmem>>, %arg5: memref<1x384xf32, #tpu.memory_space<vmem>>, %arg6: memref<384x8xf32, #tpu.memory_space<vmem>>, %arg7: memref<1x8xf32, #tpu.memory_space<vmem>>, %arg8: memref<8x8xf32, #tpu.memory_space<vmem>>) attributes {dimension_semantics = [#tpu.dimension_semantics<parallel>], iteration_bounds = array<i64: 1>, scalar_prefetch = 0 : i64, scratch_operands = 0 : i64, tpu.core_type = #tpu.core_type<tc>, window_params = [{transform_indices = @transform_0, window_bounds = array<i64: 8, 32>}, {pipeline_mode = #tpu.pipeline_mode<synchronous>, transform_indices = @transform_1, window_bounds = array<i64: 32, 512>}, {pipeline_mode = #tpu.pipeline_mode<synchronous>, transform_indices = @transform_2, window_bounds = array<i64: 1, 512>}, {pipeline_mode = #tpu.pipeline_mode<synchronous>, transform_indices = @transform_3, window_bounds = array<i64: 512, 384>}, {pipeline_mode = #tpu.pipeline_mode<synchronous>, transform_indices = @transform_4, window_bounds = array<i64: 1, 384>}, {pipeline_mode = #tpu.pipeline_mode<synchronous>, transform_indices = @transform_5, window_bounds = array<i64: 384, 8>}, {pipeline_mode = #tpu.pipeline_mode<synchronous>, transform_indices = @transform_6, window_bounds = array<i64: 1, 8>}, {transform_indices = @transform_7, window_bounds = array<i64: 8, 8>}]} {
    %c0 = arith.constant 0 : index
    %c0_0 = arith.constant 0 : index
    %0 = vector.load %arg1[%c0, %c0_0] : memref<8x32xf32, #tpu.memory_space<vmem>>, vector<8x32xf32>
    %c0_1 = arith.constant 0 : index
    %c0_2 = arith.constant 0 : index
    %1 = vector.load %arg2[%c0_1, %c0_2] : memref<32x512xf32, #tpu.memory_space<vmem>>, vector<32x512xf32>
    %cst = arith.constant dense<0.000000e+00> : vector<8x512xf32>
    %2 = tpu.matmul %0, %1, %cst {dimension_numbers = #tpu.dot_dimension_numbers<[1], [0], [0], [1], [0, 0, 1, 1], [], []>} : vector<8x32xf32>, vector<32x512xf32>, vector<8x512xf32> -> vector<8x512xf32>
    %c0_3 = arith.constant 0 : index
    %c0_4 = arith.constant 0 : index
    %3 = vector.load %arg3[%c0_3, %c0_4] : memref<1x512xf32, #tpu.memory_space<vmem>>, vector<1x512xf32>
    %4 = vector.broadcast %3 : vector<1x512xf32> to vector<8x512xf32>
    %5 = arith.addf %2, %4 : vector<8x512xf32>
    %cst_5 = arith.constant 0.000000e+00 : f32
    %6 = vector.broadcast %cst_5 : f32 to vector<8x512xf32>
    %7 = arith.maximumf %5, %6 : vector<8x512xf32>
    %c0_6 = arith.constant 0 : index
    %c0_7 = arith.constant 0 : index
    %8 = vector.load %arg4[%c0_6, %c0_7] : memref<512x384xf32, #tpu.memory_space<vmem>>, vector<512x384xf32>
    %cst_8 = arith.constant dense<0.000000e+00> : vector<8x384xf32>
    %9 = tpu.matmul %7, %8, %cst_8 {dimension_numbers = #tpu.dot_dimension_numbers<[1], [0], [0], [1], [0, 0, 1, 1], [], []>} : vector<8x512xf32>, vector<512x384xf32>, vector<8x384xf32> -> vector<8x384xf32>
    %c0_9 = arith.constant 0 : index
    %c0_10 = arith.constant 0 : index
    %10 = vector.load %arg5[%c0_9, %c0_10] : memref<1x384xf32, #tpu.memory_space<vmem>>, vector<1x384xf32>
    %11 = vector.broadcast %10 : vector<1x384xf32> to vector<8x384xf32>
    %12 = arith.addf %9, %11 : vector<8x384xf32>
    %cst_11 = arith.constant 0.000000e+00 : f32
    %13 = vector.broadcast %cst_11 : f32 to vector<8x384xf32>
    %14 = arith.maximumf %12, %13 : vector<8x384xf32>
    %c0_12 = arith.constant 0 : index
    %c0_13 = arith.constant 0 : index
    %15 = vector.load %arg6[%c0_12, %c0_13] : memref<384x8xf32, #tpu.memory_space<vmem>>, vector<384x8xf32>
    %cst_14 = arith.constant dense<0.000000e+00> : vector<8x8xf32>
    %16 = tpu.matmul %14, %15, %cst_14 {dimension_numbers = #tpu.dot_dimension_numbers<[1], [0], [0], [1], [0, 0, 1, 1], [], []>} : vector<8x384xf32>, vector<384x8xf32>, vector<8x8xf32> -> vector<8x8xf32>
    %c0_15 = arith.constant 0 : index
    %c0_16 = arith.constant 0 : index
    %17 = vector.load %arg7[%c0_15, %c0_16] : memref<1x8xf32, #tpu.memory_space<vmem>>, vector<1x8xf32>
    %18 = vector.broadcast %17 : vector<1x8xf32> to vector<8x8xf32>
    %19 = arith.addf %16, %18 : vector<8x8xf32>
    %20 = math.tanh %19 : vector<8x8xf32>
    %cst_17 = arith.constant 5.000000e-01 : f32
    %21 = vector.broadcast %cst_17 : f32 to vector<8x8xf32>
    %22 = arith.mulf %20, %21 : vector<8x8xf32>
    %cst_18 = arith.constant 1.000000e+00 : f32
    %23 = vector.broadcast %cst_18 : f32 to vector<8x8xf32>
    %24 = arith.addf %22, %23 : vector<8x8xf32>
    %c0_19 = arith.constant 0 : index
    %c0_20 = arith.constant 0 : index
    %25 = vector.load %arg8[%c0_19, %c0_20] : memref<8x8xf32, #tpu.memory_space<vmem>>, vector<8x8xf32>
    tpu.vector_store %arg8[%c0_19, %c0_20], %24 {strides = array<i32>} : memref<8x8xf32, #tpu.memory_space<vmem>>, vector<8x8xf32>,
    return
  }
  func.func @transform_0(%arg0: i32) -> (i32, i32) {
    %c0_i32 = arith.constant 0 : i32
    %c0_i32_0 = arith.constant 0 : i32
    return %arg0, %c0_i32 : i32, i32
  }
  func.func @transform_1(%arg0: i32) -> (i32, i32) {
    %c0_i32 = arith.constant 0 : i32
    %c0_i32_0 = arith.constant 0 : i32
    %c0_i32_1 = arith.constant 0 : i32
    return %c0_i32, %c0_i32_0 : i32, i32
  }
  func.func @transform_2(%arg0: i32) -> (i32, i32) {
    %c0_i32 = arith.constant 0 : i32
    %c0_i32_0 = arith.constant 0 : i32
    %c0_i32_1 = arith.constant 0 : i32
    return %c0_i32, %c0_i32_0 : i32, i32
  }
  func.func @transform_3(%arg0: i32) -> (i32, i32) {
    %c0_i32 = arith.constant 0 : i32
    %c0_i32_0 = arith.constant 0 : i32
    %c0_i32_1 = arith.constant 0 : i32
    return %c0_i32, %c0_i32_0 : i32, i32
  }
  func.func @transform_4(%arg0: i32) -> (i32, i32) {
    %c0_i32 = arith.constant 0 : i32
    %c0_i32_0 = arith.constant 0 : i32
    %c0_i32_1 = arith.constant 0 : i32
    return %c0_i32, %c0_i32_0 : i32, i32
  }
  func.func @transform_5(%arg0: i32) -> (i32, i32) {
    %c0_i32 = arith.constant 0 : i32
    %c0_i32_0 = arith.constant 0 : i32
    %c0_i32_1 = arith.constant 0 : i32
    return %c0_i32, %c0_i32_0 : i32, i32
  }
  func.func @transform_6(%arg0: i32) -> (i32, i32) {
    %c0_i32 = arith.constant 0 : i32
    %c0_i32_0 = arith.constant 0 : i32
    %c0_i32_1 = arith.constant 0 : i32
    return %c0_i32, %c0_i32_0 : i32, i32
  }
  func.func @transform_7(%arg0: i32) -> (i32, i32) {
    %c0_i32 = arith.constant 0 : i32
    %c0_i32_0 = arith.constant 0 : i32
    return %arg0, %c0_i32 : i32, i32
  }
}

</mosaic_0001>

<bundles_post_ra>
// kernel: tpu_custom_call.1
= control target key start
LH: loop header
LB: loop body
LE: loop exit
PB: predicated region body
PF: predicated region fallthrough
CT: control target
= control target key end

     0   :  { %12 = vsyncpa [#allocation3], 0  ;;  %s1458_s0 = inlined_call_operand.vmem [shape: f32[8,32], index: 0, kind: input, shape index: {}]   ;;  %s1459_s1 = inlined_call_operand.vmem [shape: f32[32,512], index: 1, kind: input, shape index: {}]   ;;  %s1460_s2 = inlined_call_operand.vmem [shape: f32[1,512], index: 2, kind: input, shape index: {}]   ;;  %s1461_s3 = inlined_call_operand.hbm [shape: f32[512,384], index: 3, kind: input, shape index: {}]   ;;  %s1462_s4 = inlined_call_operand.vmem [shape: f32[1,384], index: 4, kind: input, shape index: {}]   ;;  %s1463_s5 = inlined_call_operand.vmem [shape: f32[384,8], index: 5, kind: input, shape index: {}]   ;;  %s1464_s6 = inlined_call_operand.vmem [shape: f32[1,8], index: 6, kind: input, shape index: {}]   ;;  %s1465_s7 = inlined_call_operand.hbm [shape: f32[8,8], index: 7, kind: output, shape index: {}]  }
   0x1   :  { %13 = vsyncpa [#allocation4], 0  ;;  %s1151_s24 = smov [#allocation2]  }
   0x2   :  { %s25_s25 = sshll.u32 %s1151_s24, 4  ;;  %s26_s25 = int_to_ptr.vmem [resolvable:$true] %s25_s25 }
   0x3   :  { %s1115_s26 = scalar_lea.vmem %s26_s25, 24576  ;;  %p1120_p1 = scmp.lt.s32.totalorder %s26_s25, %s26_s25 }
   0x4   :  { %p1116_p0 = scmp.ne.s32.totalorder %s26_s25, %s1115_s26  ;;  %p1121_p2 = scmp.lt.s32.totalorder %s1115_s26, %s1115_s26 }
   0x6   :  { %p1122_p3 = por %p1121_p2, %p1120_p1 }
   0x8   :  { %p1123_p4 = pnand %p1122_p3, %p1116_p0 }
   0xa   :  { %1126 = shalt.err (!%p1123_p4)
}
   0xb   :  { %s1152_s27 = smov 384   ;;  %s1153_s28 = smov 24  }
   0xc   :  { %31 = dma.hbm_to_vmem [thread:$0]  %s1461_s3, 24576, %s26_s25, [#allocation3], %s1152_s27, %s1152_s27, %s1153_s28  }
   0xd   :  { %1147 = dma.done.wait [#allocation3], 24576  }
   0xe   :  { %1148 = vsyncadd [#allocation3], 4294942720  ;;  %v1154_v0 = vmov 0.0   ;;  %v55_v1 = vld [vmem:[%s1459_s1 + $0x68] sm:$0xff]  ;;  %v57_v2 = vld [vmem:[%s1459_s1 + $0x78] sm:$0xff]  ;;  %vm80_vm0 = vcmask 261120  }
   0xf   :  { %148 = vmatprep.mubr.f32.mxu0 %v1154_v0  ;;  %219 = vmatprep.mubr.f32.mxu1 %v1154_v0  ;;  %v54_v3 = vld [vmem:[%s1459_s1 + $0x60] sm:$0xff]  ;;  %v56_v4 = vld [vmem:[%s1459_s1 + $0x70] sm:$0xff]  ;;  %v51_v5 = vld [vmem:[%s1459_s1 + $0x48] sm:$0xff]  ;;  %vm1155_vm1 = vmmov 0   ;;  %s1156_s10 = smov [#allocation5]   ;;  %vm922_vm2 = vcmask 64512  }
  0x10   :  { %108 = vmatprep.subr.mxu0 %v55_v1  ;;  %179 = vmatprep.subr.mxu1 %v57_v2  ;;  %v53_v6 = vld [vmem:[%s1459_s1 + $0x58] sm:$0xff]  ;;  %v50_v7 = vld [vmem:[%s1459_s1 + $0x40] sm:$0xff]  ;;  %v52_v8 = vld [vmem:[%s1459_s1 + $0x50] sm:$0xff]  ;;  %s930_s11 = sshll.u32 %s1156_s10, 4  ;;  %s931_s11 = int_to_ptr.vmem [resolvable:$true] %s930_s11 }
  0x11   :  { %109 = vmatpush1.msra.mxu0 %v54_v3  ;;  %180 = vmatpush1.msra.mxu1 %v56_v4  ;;  %v47_v9 = vld [vmem:[%s1459_s1 + $0x28] sm:$0xff]  ;;  %v49_v10 = vld [vmem:[%s1459_s1 + $0x38] sm:$0xff]  ;;  %v46_v11 = vld [vmem:[%s1459_s1 + $0x20] sm:$0xff]  ;;  %s1127_s12 = scalar_lea.vmem %s931_s11, 128  ;;  %p1132_p6 = scmp.lt.s32.totalorder %s931_s11, %s931_s11 }
  0x12   :  { %110 = vmatprep.subr.mxu0 %v51_v5  ;;  %181 = vmatprep.subr.mxu1 %v53_v6  ;;  %v48_v12 = vld [vmem:[%s1459_s1 + $0x30] sm:$0xff]  ;;  %v43_v13 = vld [vmem:[%s1459_s1 + $0x8] sm:$0xff]  ;;  %v45_v14 = vld [vmem:[%s1459_s1 + $0x18] sm:$0xff]  ;;  %p1128_p5 = scmp.ne.s32.totalorder %s931_s11, %s1127_s12  ;;  %p1133_p7 = scmp.lt.s32.totalorder %s1127_s12, %s1127_s12 }
  0x13   :  { %111 = vmatpush1.msra.mxu0 %v50_v7  ;;  %182 = vmatpush1.msra.mxu1 %v52_v8  ;;  %v42_v15 = vld [vmem:[%s1459_s1] sm:$0xff]  ;;  %v44_v16 = vld [vmem:[%s1459_s1 + $0x10] sm:$0xff]  ;;  %v275_v20 = vld [vmem:[#allocation2 + $0x168] sm:$0xff] }
  0x14   :  { %112 = vmatprep.subr.mxu0 %v47_v9  ;;  %183 = vmatprep.subr.mxu1 %v49_v10  ;;  %v41_v17 = vld [vmem:[%s1458_s0] sm:$0xff]  ;;  %v276_v18 = vld [vmem:[#allocation2 + $0x170] sm:$0xff]  ;;  %v371_v21 = vld [vmem:[#allocation2 + $0x468] sm:$0xff]  ;;  %p1134_p8 = por %p1133_p7, %p1132_p6 }
  0x15   :  { %113 = vmatpush1.msra.mxu0 %v46_v11  ;;  %184 = vmatpush1.msra.mxu1 %v48_v12  ;;  %v372_v19 = vld [vmem:[#allocation2 + $0x470] sm:$0xff]  ;;  %v273_v22 = vld [vmem:[#allocation2 + $0x158] sm:$0xff]  ;;  %v270_v26 = vld [vmem:[#allocation2 + $0x140] sm:$0xff] }
  0x16   :  { %114 = vmatprep.subr.mxu0 %v43_v13  ;;  %185 = vmatprep.subr.mxu1 %v45_v14  ;;  %v369_v23 = vld [vmem:[#allocation2 + $0x458] sm:$0xff]  ;;  %v272_v24 = vld [vmem:[#allocation2 + $0x150] sm:$0xff]  ;;  %v366_v27 = vld [vmem:[#allocation2 + $0x440] sm:$0xff]  ;;  %p1135_p9 = pnand %p1134_p8, %p1128_p5 }
  0x17   :  { %115 = vmatpush1.msra.mxu0 %v42_v15  ;;  %186 = vmatpush1.msra.mxu1 %v44_v16  ;;  %v368_v25 = vld [vmem:[#allocation2 + $0x450] sm:$0xff]  ;;  %v269_v28 = vld [vmem:[#allocation2 + $0x138] sm:$0xff]  ;;  %v267_v30 = vld [vmem:[#allocation2 + $0x128] sm:$0xff] }
  0x18   :  { %939 = vmatmul.mubr.msk.f32.vlgmr.msra.gmra.mxu0 %vm80_vm0, %v41_v17  ;;  %940 = vmatmul.mubr.msk.f32.vlgmr.msra.gmra.mxu1 %vm80_vm0, %v41_v17  ;;  %v365_v29 = vld [vmem:[#allocation2 + $0x438] sm:$0xff]  ;;  %v363_v31 = vld [vmem:[#allocation2 + $0x428] sm:$0xff]  ;;  %v266_v32 = vld [vmem:[#allocation2 + $0x120] sm:$0xff] }
  0x19   :  { %439 = vmatprep.subr.mxu0 %v276_v18  ;;  %510 = vmatprep.subr.mxu1 %v372_v19  ;;  %v362_v33 = vld [vmem:[#allocation2 + $0x420] sm:$0xff]  ;;  %v264_v34 = vld [vmem:[#allocation2 + $0x110] sm:$0xff]  ;;  %v263_v36 = vld [vmem:[#allocation2 + $0x108] sm:$0xff] }
  0x1a   :  { %440 = vmatpush1.msra.mxu0 %v275_v20  ;;  %511 = vmatpush1.msra.mxu1 %v371_v21  ;;  %v360_v35 = vld [vmem:[#allocation2 + $0x410] sm:$0xff]  ;;  %v359_v37 = vld [vmem:[#allocation2 + $0x408] sm:$0xff]  ;;  %v261_v38 = vld [vmem:[#allocation2 + $0xf8] sm:$0xff] }
  0x1b   :  { %441 = vmatprep.subr.mxu0 %v273_v22  ;;  %512 = vmatprep.subr.mxu1 %v369_v23  ;;  %v357_v39 = vld [vmem:[#allocation2 + $0x3f8] sm:$0xff]  ;;  %v260_v40 = vld [vmem:[#allocation2 + $0xf0] sm:$0xff]  ;;  %v258_v42 = vld [vmem:[#allocation2 + $0xe0] sm:$0xff] }
  0x1c   :  { %442 = vmatpush1.msra.mxu0 %v272_v24  ;;  %513 = vmatpush1.msra.mxu1 %v368_v25  ;;  %v356_v41 = vld [vmem:[#allocation2 + $0x3f0] sm:$0xff]  ;;  %v354_v43 = vld [vmem:[#allocation2 + $0x3e0] sm:$0xff]  ;;  %v257_v44 = vld [vmem:[#allocation2 + $0xd8] sm:$0xff] }
  0x1d   :  { %443 = vmatprep.subr.mxu0 %v270_v26  ;;  %514 = vmatprep.subr.mxu1 %v366_v27  ;;  %v353_v45 = vld [vmem:[#allocation2 + $0x3d8] sm:$0xff]  ;;  %v255_v46 = vld [vmem:[#allocation2 + $0xc8] sm:$0xff]  ;;  %v254_v48 = vld [vmem:[#allocation2 + $0xc0] sm:$0xff] }
  0x1e   :  { %444 = vmatpush1.msra.mxu0 %v269_v28  ;;  %515 = vmatpush1.msra.mxu1 %v365_v29  ;;  %v351_v47 = vld [vmem:[#allocation2 + $0x3c8] sm:$0xff]  ;;  %v350_v49 = vld [vmem:[#allocation2 + $0x3c0] sm:$0xff]  ;;  %v252_v50 = vld [vmem:[#allocation2 + $0xb0] sm:$0xff] }
  0x1f   :  { %445 = vmatprep.subr.mxu0 %v267_v30  ;;  %516 = vmatprep.subr.mxu1 %v363_v31  ;;  %v348_v51 = vld [vmem:[#allocation2 + $0x3b0] sm:$0xff]  ;;  %v251_v52 = vld [vmem:[#allocation2 + $0xa8] sm:$0xff]  ;;  %v249_v54 = vld [vmem:[#allocation2 + $0x98] sm:$0xff] }
  0x20   :  { %446 = vmatpush1.msra.mxu0 %v266_v32  ;;  %517 = vmatpush1.msra.mxu1 %v362_v33  ;;  %v347_v53 = vld [vmem:[#allocation2 + $0x3a8] sm:$0xff]  ;;  %v345_v55 = vld [vmem:[#allocation2 + $0x398] sm:$0xff]  ;;  %v248_v56 = vld [vmem:[#allocation2 + $0x90] sm:$0xff] }
  0x21   :  { %447 = vmatprep.subr.mxu0 %v264_v34  ;;  %518 = vmatprep.subr.mxu1 %v360_v35  ;;  %v344_v57 = vld [vmem:[#allocation2 + $0x390] sm:$0xff]  ;;  %v246_v58 = vld [vmem:[#allocation2 + $0x80] sm:$0xff]  ;;  %v245_v60 = vld [vmem:[#allocation2 + $0x78] sm:$0xff] }
  0x22   :  { %448 = vmatpush1.msra.mxu0 %v263_v36  ;;  %519 = vmatpush1.msra.mxu1 %v359_v37  ;;  %v342_v59 = vld [vmem:[#allocation2 + $0x380] sm:$0xff]  ;;  %v341_v61 = vld [vmem:[#allocation2 + $0x378] sm:$0xff]  ;;  %v243_v62 = vld [vmem:[#allocation2 + $0x68] sm:$0xff] }
  0x23   :  { %449 = vmatprep.subr.mxu0 %v261_v38  ;;  %520 = vmatprep.subr.mxu1 %v357_v39  ;;  %v339_v63 = vld [vmem:[#allocation2 + $0x368] sm:$0xff]  ;;  %v242_v1 = vld [vmem:[#allocation2 + $0x60] sm:$0xff]  ;;  %v240_v3 = vld [vmem:[#allocation2 + $0x50] sm:$0xff] }
  0x24   :  { %450 = vmatpush1.msra.mxu0 %v260_v40  ;;  %521 = vmatpush1.msra.mxu1 %v356_v41  ;;  %v338_v2 = vld [vmem:[#allocation2 + $0x360] sm:$0xff]  ;;  %v336_v4 = vld [vmem:[#allocation2 + $0x350] sm:$0xff]  ;;  %v239_v5 = vld [vmem:[#allocation2 + $0x48] sm:$0xff] }
  0x25   :  { %451 = vmatprep.subr.mxu0 %v258_v42  ;;  %522 = vmatprep.subr.mxu1 %v354_v43  ;;  %v335_v6 = vld [vmem:[#allocation2 + $0x348] sm:$0xff]  ;;  %v237_v7 = vld [vmem:[#allocation2 + $0x38] sm:$0xff]  ;;  %v236_v9 = vld [vmem:[#allocation2 + $0x30] sm:$0xff] }
  0x26   :  { %452 = vmatpush1.msra.mxu0 %v257_v44  ;;  %523 = vmatpush1.msra.mxu1 %v353_v45  ;;  %v333_v8 = vld [vmem:[#allocation2 + $0x338] sm:$0xff]  ;;  %v332_v10 = vld [vmem:[#allocation2 + $0x330] sm:$0xff]  ;;  %v234_v11 = vld [vmem:[#allocation2 + $0x20] sm:$0xff] }
  0x27   :  { %453 = vmatprep.subr.mxu0 %v255_v46  ;;  %524 = vmatprep.subr.mxu1 %v351_v47  ;;  %v330_v12 = vld [vmem:[#allocation2 + $0x320] sm:$0xff]  ;;  %v233_v13 = vld [vmem:[#allocation2 + $0x18] sm:$0xff]  ;;  %v231_v15 = vld [vmem:[#allocation2 + $0x8] sm:$0xff] }
  0x28   :  { %454 = vmatpush1.msra.mxu0 %v254_v48  ;;  %525 = vmatpush1.msra.mxu1 %v350_v49  ;;  %v329_v14 = vld [vmem:[#allocation2 + $0x318] sm:$0xff]  ;;  %v327_v16 = vld [vmem:[#allocation2 + $0x308] sm:$0xff]  ;;  %v230_v17 = vld [vmem:[#allocation2] sm:$0xff] }
  0x29   :  { %455 = vmatprep.subr.mxu0 %v252_v50  ;;  %526 = vmatprep.subr.mxu1 %v348_v51  ;;  %v326_v18 = vld [vmem:[#allocation2 + $0x300] sm:$0xff]  ;;  %v324_v19 = vld [vmem:[#allocation2 + $0x2f0] sm:$0xff]  ;;  %v323_v21 = vld [vmem:[#allocation2 + $0x2e8] sm:$0xff] }
  0x2a   :  { %456 = vmatpush1.msra.mxu0 %v251_v52  ;;  %527 = vmatpush1.msra.mxu1 %v347_v53  ;;  %v420_v20 = vld [vmem:[#allocation2 + $0x5f0] sm:$0xff]  ;;  %v419_v22 = vld [vmem:[#allocation2 + $0x5e8] sm:$0xff]  ;;  %v321_v23 = vld [vmem:[#allocation2 + $0x2d8] sm:$0xff] }
  0x2b   :  { %457 = vmatprep.subr.mxu0 %v249_v54  ;;  %528 = vmatprep.subr.mxu1 %v345_v55  ;;  %v417_v24 = vld [vmem:[#allocation2 + $0x5d8] sm:$0xff]  ;;  %v320_v25 = vld [vmem:[#allocation2 + $0x2d0] sm:$0xff]  ;;  %v318_v27 = vld [vmem:[#allocation2 + $0x2c0] sm:$0xff] }
  0x2c   :  { %458 = vmatpush1.msra.mxu0 %v248_v56  ;;  %529 = vmatpush1.msra.mxu1 %v344_v57  ;;  %v416_v26 = vld [vmem:[#allocation2 + $0x5d0] sm:$0xff]  ;;  %v414_v28 = vld [vmem:[#allocation2 + $0x5c0] sm:$0xff]  ;;  %v317_v29 = vld [vmem:[#allocation2 + $0x2b8] sm:$0xff] }
  0x2d   :  { %459 = vmatprep.subr.mxu0 %v246_v58  ;;  %530 = vmatprep.subr.mxu1 %v342_v59  ;;  %v413_v30 = vld [vmem:[#allocation2 + $0x5b8] sm:$0xff]  ;;  %v315_v31 = vld [vmem:[#allocation2 + $0x2a8] sm:$0xff]  ;;  %v314_v33 = vld [vmem:[#allocation2 + $0x2a0] sm:$0xff] }
  0x2e   :  { %460 = vmatpush1.msra.mxu0 %v245_v60  ;;  %531 = vmatpush1.msra.mxu1 %v341_v61  ;;  %v411_v32 = vld [vmem:[#allocation2 + $0x5a8] sm:$0xff]  ;;  %v410_v34 = vld [vmem:[#allocation2 + $0x5a0] sm:$0xff]  ;;  %v312_v35 = vld [vmem:[#allocation2 + $0x290] sm:$0xff] }
  0x2f   :  { %461 = vmatprep.subr.mxu0 %v243_v62  ;;  %532 = vmatprep.subr.mxu1 %v339_v63  ;;  %v408_v36 = vld [vmem:[#allocation2 + $0x590] sm:$0xff]  ;;  %v311_v37 = vld [vmem:[#allocation2 + $0x288] sm:$0xff]  ;;  %v309_v39 = vld [vmem:[#allocation2 + $0x278] sm:$0xff] }
  0x30   :  { %462 = vmatpush1.msra.mxu0 %v242_v1  ;;  %533 = vmatpush1.msra.mxu1 %v338_v2  ;;  %v407_v38 = vld [vmem:[#allocation2 + $0x588] sm:$0xff]  ;;  %v405_v40 = vld [vmem:[#allocation2 + $0x578] sm:$0xff]  ;;  %v308_v41 = vld [vmem:[#allocation2 + $0x270] sm:$0xff] }
  0x31   :  { %463 = vmatprep.subr.mxu0 %v240_v3  ;;  %534 = vmatprep.subr.mxu1 %v336_v4  ;;  %v404_v42 = vld [vmem:[#allocation2 + $0x570] sm:$0xff]  ;;  %v306_v43 = vld [vmem:[#allocation2 + $0x260] sm:$0xff]  ;;  %v305_v45 = vld [vmem:[#allocation2 + $0x258] sm:$0xff] }
  0x32   :  { %464 = vmatpush1.msra.mxu0 %v239_v5  ;;  %535 = vmatpush1.msra.mxu1 %v335_v6  ;;  %v402_v44 = vld [vmem:[#allocation2 + $0x560] sm:$0xff]  ;;  %v401_v46 = vld [vmem:[#allocation2 + $0x558] sm:$0xff]  ;;  %v303_v47 = vld [vmem:[#allocation2 + $0x248] sm:$0xff] }
  0x33   :  { %465 = vmatprep.subr.mxu0 %v237_v7  ;;  %536 = vmatprep.subr.mxu1 %v333_v8  ;;  %v399_v48 = vld [vmem:[#allocation2 + $0x548] sm:$0xff]  ;;  %v302_v49 = vld [vmem:[#allocation2 + $0x240] sm:$0xff]  ;;  %v300_v51 = vld [vmem:[#allocation2 + $0x230] sm:$0xff] }
  0x34   :  { %466 = vmatpush1.msra.mxu0 %v236_v9  ;;  %537 = vmatpush1.msra.mxu1 %v332_v10  ;;  %v398_v50 = vld [vmem:[#allocation2 + $0x540] sm:$0xff]  ;;  %v396_v52 = vld [vmem:[#allocation2 + $0x530] sm:$0xff]  ;;  %v299_v53 = vld [vmem:[#allocation2 + $0x228] sm:$0xff] }
  0x35   :  { %467 = vmatprep.subr.mxu0 %v234_v11  ;;  %538 = vmatprep.subr.mxu1 %v330_v12  ;;  %v395_v54 = vld [vmem:[#allocation2 + $0x528] sm:$0xff]  ;;  %v297_v55 = vld [vmem:[#allocation2 + $0x218] sm:$0xff]  ;;  %v296_v57 = vld [vmem:[#allocation2 + $0x210] sm:$0xff] }
  0x36   :  { %468 = vmatpush1.msra.mxu0 %v233_v13  ;;  %539 = vmatpush1.msra.mxu1 %v329_v14  ;;  %v393_v56 = vld [vmem:[#allocation2 + $0x518] sm:$0xff]  ;;  %v392_v58 = vld [vmem:[#allocation2 + $0x510] sm:$0xff]  ;;  %v294_v59 = vld [vmem:[#allocation2 + $0x200] sm:$0xff] }
  0x37   :  { %469 = vmatprep.subr.mxu0 %v231_v15  ;;  %540 = vmatprep.subr.mxu1 %v327_v16  ;;  %v390_v60 = vld [vmem:[#allocation2 + $0x500] sm:$0xff]  ;;  %v293_v61 = vld [vmem:[#allocation2 + $0x1f8] sm:$0xff]  ;;  %v291_v63 = vld [vmem:[#allocation2 + $0x1e8] sm:$0xff] }
  0x38   :  { %470 = vmatpush1.msra.mxu0 %v230_v17  ;;  %541 = vmatpush1.msra.mxu1 %v326_v18  ;;  %v389_v62 = vld [vmem:[#allocation2 + $0x4f8] sm:$0xff]  ;;  %v387_v1 = vld [vmem:[#allocation2 + $0x4e8] sm:$0xff]  ;;  %v290_v2 = vld [vmem:[#allocation2 + $0x1e0] sm:$0xff] }
  0x39   :  { %471 = vmatprep.subr.mxu0 %v324_v19  ;;  %542 = vmatprep.subr.mxu1 %v420_v20  ;;  %v386_v3 = vld [vmem:[#allocation2 + $0x4e0] sm:$0xff]  ;;  %v288_v4 = vld [vmem:[#allocation2 + $0x1d0] sm:$0xff]  ;;  %v287_v6 = vld [vmem:[#allocation2 + $0x1c8] sm:$0xff] }
  0x3a   :  { %472 = vmatpush2.msra.mxu0 %v323_v21  ;;  %543 = vmatpush2.msra.mxu1 %v419_v22  ;;  %v384_v5 = vld [vmem:[#allocation2 + $0x4d0] sm:$0xff]  ;;  %v383_v7 = vld [vmem:[#allocation2 + $0x4c8] sm:$0xff]  ;;  %v285_v8 = vld [vmem:[#allocation2 + $0x1b8] sm:$0xff]  ;;  %v60_v22 = vlaneseq }
  0x3b   :  { %473 = vmatprep.subr.mxu0 %v321_v23  ;;  %544 = vmatprep.subr.mxu1 %v417_v24  ;;  %v381_v9 = vld [vmem:[#allocation2 + $0x4b8] sm:$0xff]  ;;  %v284_v10 = vld [vmem:[#allocation2 + $0x1b0] sm:$0xff]  ;;  %v282_v12 = vld [vmem:[#allocation2 + $0x1a0] sm:$0xff] }
  0x3c   :  { %474 = vmatpush2.msra.mxu0 %v320_v25  ;;  %545 = vmatpush2.msra.mxu1 %v416_v26  ;;  %v380_v11 = vld [vmem:[#allocation2 + $0x4b0] sm:$0xff]  ;;  %v378_v13 = vld [vmem:[#allocation2 + $0x4a0] sm:$0xff]  ;;  %v281_v14 = vld [vmem:[#allocation2 + $0x198] sm:$0xff]  ;;  %v1253_v23 = vshrl.u32 %v60_v22, 7 }
  0x3d   :  { %475 = vmatprep.subr.mxu0 %v318_v27  ;;  %546 = vmatprep.subr.mxu1 %v414_v28  ;;  %v377_v15 = vld [vmem:[#allocation2 + $0x498] sm:$0xff]  ;;  %v279_v16 = vld [vmem:[#allocation2 + $0x188] sm:$0xff]  ;;  %v278_v18 = vld [vmem:[#allocation2 + $0x180] sm:$0xff] }
  0x3e   :  { %476 = vmatpush2.msra.mxu0 %v317_v29  ;;  %547 = vmatpush2.msra.mxu1 %v413_v30  ;;  %v375_v17 = vld [vmem:[#allocation2 + $0x488] sm:$0xff]  ;;  %v374_v19 = vld [vmem:[#allocation2 + $0x480] sm:$0xff]  ;;  %v325_v20 = vld [vmem:[#allocation2 + $0x2f8] sm:$0xff]  ;;  %v70_v24 = vsub.s32 2, %v1253_v23  ;;  %v62_v25 = vsub.s32 0, %v1253_v23  ;;  %v66_v27 = vsub.s32 1, %v1253_v23 }
  0x3f   :  { %477 = vmatprep.subr.mxu0 %v315_v31  ;;  %548 = vmatprep.subr.mxu1 %v411_v32  ;;  %v421_v21 = vld [vmem:[#allocation2 + $0x5f8] sm:$0xff]  ;;  %v58_v26 = vld [vmem:[%s1460_s2] sm:$0xf]  ;;  %v74_v28 = vsub.s32 3, %v1253_v23  ;;  %v247_v22 = vld [vmem:[#allocation2 + $0x88] sm:$0xff] }
  0x40   :  { %478 = vmatpush2.msra.mxu0 %v314_v33  ;;  %549 = vmatpush2.msra.mxu1 %v410_v34  ;;  %v71_v29 = vrot.slane %v58_v26, %v70_v24  ;;  %v63_v30 = vrot.slane %v58_v26, %v62_v25  ;;  %v67_v31 = vrot.slane %v58_v26, %v66_v27 }
  0x41   :  { %479 = vmatprep.subr.mxu0 %v312_v35  ;;  %550 = vmatprep.subr.mxu1 %v408_v36  ;;  %v75_v32 = vrot.slane %v58_v26, %v74_v28  ;;  %v343_v26 = vld [vmem:[#allocation2 + $0x388] sm:$0xff]  ;;  %v292_v28 = vld [vmem:[#allocation2 + $0x1f0] sm:$0xff] }
  0x42   :  { %480 = vmatpush2.msra.mxu0 %v311_v37  ;;  %551 = vmatpush2.msra.mxu1 %v407_v38 }
  0x43   :  { %481 = vmatprep.subr.mxu0 %v309_v39  ;;  %552 = vmatprep.subr.mxu1 %v405_v40 }
  0x44   :  { %482 = vmatpush2.msra.mxu0 %v308_v41  ;;  %553 = vmatpush2.msra.mxu1 %v404_v42 }
  0x45   :  { %483 = vmatprep.subr.mxu0 %v306_v43  ;;  %554 = vmatprep.subr.mxu1 %v402_v44 }
  0x46   :  { %484 = vmatpush2.msra.mxu0 %v305_v45  ;;  %555 = vmatpush2.msra.mxu1 %v401_v46  ;;  %v277_v45 = vld [vmem:[#allocation2 + $0x178] sm:$0xff] }
  0x47   :  { %485 = vmatprep.subr.mxu0 %v303_v47  ;;  %556 = vmatprep.subr.mxu1 %v399_v48  ;;  %v373_v46 = vld [vmem:[#allocation2 + $0x478] sm:$0xff]  ;;  %v322_v47 = vld [vmem:[#allocation2 + $0x2e0] sm:$0xff] }
  0x48   :  { %486 = vmatpush2.msra.mxu0 %v302_v49  ;;  %557 = vmatpush2.msra.mxu1 %v398_v50  ;;  %v418_v48 = vld [vmem:[#allocation2 + $0x5e0] sm:$0xff] }
  0x49   :  { %487 = vmatprep.subr.mxu0 %v300_v51  ;;  %558 = vmatprep.subr.mxu1 %v396_v52  ;;  %v274_v49 = vld [vmem:[#allocation2 + $0x160] sm:$0xff]  ;;  %v319_v51 = vld [vmem:[#allocation2 + $0x2c8] sm:$0xff] }
  0x4a   :  { %488 = vmatpush2.msra.mxu0 %v299_v53  ;;  %559 = vmatpush2.msra.mxu1 %v395_v54  ;;  %v370_v50 = vld [vmem:[#allocation2 + $0x460] sm:$0xff]  ;;  %v415_v52 = vld [vmem:[#allocation2 + $0x5c8] sm:$0xff] }
  0x4b   :  { %489 = vmatprep.subr.mxu0 %v297_v55  ;;  %560 = vmatprep.subr.mxu1 %v393_v56  ;;  %v271_v53 = vld [vmem:[#allocation2 + $0x148] sm:$0xff]  ;;  %v316_v55 = vld [vmem:[#allocation2 + $0x2b0] sm:$0xff] }
  0x4c   :  { %490 = vmatpush2.msra.mxu0 %v296_v57  ;;  %561 = vmatpush2.msra.mxu1 %v392_v58  ;;  %v367_v54 = vld [vmem:[#allocation2 + $0x448] sm:$0xff]  ;;  %v412_v56 = vld [vmem:[#allocation2 + $0x5b0] sm:$0xff] }
  0x4d   :  { %491 = vmatprep.subr.mxu0 %v294_v59  ;;  %562 = vmatprep.subr.mxu1 %v390_v60  ;;  %v268_v57 = vld [vmem:[#allocation2 + $0x130] sm:$0xff]  ;;  %v313_v59 = vld [vmem:[#allocation2 + $0x298] sm:$0xff] }
  0x4e   :  { %492 = vmatpush2.msra.mxu0 %v293_v61  ;;  %563 = vmatpush2.msra.mxu1 %v389_v62  ;;  %v364_v58 = vld [vmem:[#allocation2 + $0x430] sm:$0xff]  ;;  %v409_v60 = vld [vmem:[#allocation2 + $0x598] sm:$0xff] }
  0x4f   :  { %493 = vmatprep.subr.mxu0 %v291_v63  ;;  %564 = vmatprep.subr.mxu1 %v387_v1  ;;  %v265_v61 = vld [vmem:[#allocation2 + $0x118] sm:$0xff]  ;;  %v310_v63 = vld [vmem:[#allocation2 + $0x280] sm:$0xff] }
  0x50   :  { %494 = vmatpush2.msra.mxu0 %v290_v2  ;;  %565 = vmatpush2.msra.mxu1 %v386_v3  ;;  %v361_v62 = vld [vmem:[#allocation2 + $0x418] sm:$0xff]  ;;  %v406_v1 = vld [vmem:[#allocation2 + $0x580] sm:$0xff] }
  0x51   :  { %495 = vmatprep.subr.mxu0 %v288_v4  ;;  %566 = vmatprep.subr.mxu1 %v384_v5  ;;  %v262_v2 = vld [vmem:[#allocation2 + $0x100] sm:$0xff]  ;;  %v307_v4 = vld [vmem:[#allocation2 + $0x268] sm:$0xff] }
  0x52   :  { %496 = vmatpush2.msra.mxu0 %v287_v6  ;;  %567 = vmatpush2.msra.mxu1 %v383_v7  ;;  %v358_v3 = vld [vmem:[#allocation2 + $0x400] sm:$0xff]  ;;  %v403_v5 = vld [vmem:[#allocation2 + $0x568] sm:$0xff] }
  0x53   :  { %497 = vmatprep.subr.mxu0 %v285_v8  ;;  %568 = vmatprep.subr.mxu1 %v381_v9  ;;  %v259_v6 = vld [vmem:[#allocation2 + $0xe8] sm:$0xff]  ;;  %v304_v8 = vld [vmem:[#allocation2 + $0x250] sm:$0xff] }
  0x54   :  { %498 = vmatpush2.msra.mxu0 %v284_v10  ;;  %569 = vmatpush2.msra.mxu1 %v380_v11  ;;  %v355_v7 = vld [vmem:[#allocation2 + $0x3e8] sm:$0xff]  ;;  %v400_v9 = vld [vmem:[#allocation2 + $0x550] sm:$0xff] }
  0x55   :  { %499 = vmatprep.subr.mxu0 %v282_v12  ;;  %570 = vmatprep.subr.mxu1 %v378_v13  ;;  %v256_v10 = vld [vmem:[#allocation2 + $0xd0] sm:$0xff]  ;;  %v301_v12 = vld [vmem:[#allocation2 + $0x238] sm:$0xff] }
  0x56   :  { %500 = vmatpush2.msra.mxu0 %v281_v14  ;;  %571 = vmatpush2.msra.mxu1 %v377_v15  ;;  %v352_v11 = vld [vmem:[#allocation2 + $0x3d0] sm:$0xff]  ;;  %v397_v13 = vld [vmem:[#allocation2 + $0x538] sm:$0xff] }
  0x57   :  { %501 = vmatprep.subr.mxu0 %v279_v16  ;;  %572 = vmatprep.subr.mxu1 %v375_v17  ;;  %v253_v14 = vld [vmem:[#allocation2 + $0xb8] sm:$0xff]  ;;  %v298_v16 = vld [vmem:[#allocation2 + $0x220] sm:$0xff] }
  0x58   :  { %502 = vmatpush2.msra.mxu0 %v278_v18  ;;  %573 = vmatpush2.msra.mxu1 %v374_v19  ;;  %v349_v15 = vld [vmem:[#allocation2 + $0x3b8] sm:$0xff]  ;;  %v394_v17 = vld [vmem:[#allocation2 + $0x520] sm:$0xff] }
  0x59   :  { %942 = vmatprep.subr.mxu0 %v325_v20  ;;  %977 = vmatprep.subr.mxu1 %v421_v21  ;;  %v250_v18 = vld [vmem:[#allocation2 + $0xa0] sm:$0xff]  ;;  %v295_v20 = vld [vmem:[#allocation2 + $0x208] sm:$0xff] }
  0x5a   :  { %v346_v19 = vld [vmem:[#allocation2 + $0x3a0] sm:$0xff]  ;;  %v391_v21 = vld [vmem:[#allocation2 + $0x508] sm:$0xff] }
  0xd8   :  { %v150_v33 = vpop.f32.mrf.mxu0  ;;  %v221_v34 = vpop.f32.mrf.mxu1 }
  0xd9   :  { %v1268_v35 = vadd.f32 %v221_v34, %v71_v29  ;;  %v1270_v36 = vadd.f32 %v150_v33, %v63_v30  ;;  %v388_v29 = vld [vmem:[#allocation2 + $0x4f0] sm:$0xff]  ;;  %v385_v33 = vld [vmem:[#allocation2 + $0x4d8] sm:$0xff] }
  0xda   :  { %v152_v37 = vpop.f32.mrf.mxu0  ;;  %v223_v38 = vpop.f32.mrf.mxu1  ;;  %v244_v30 = vld [vmem:[#allocation2 + $0x70] sm:$0xff]  ;;  %v241_v34 = vld [vmem:[#allocation2 + $0x58] sm:$0xff] }
  0xdb   :  { %v153_v39 = vadd.f32 %v152_v37, %v67_v31  ;;  %v224_v40 = vadd.f32 %v223_v38, %v75_v32  ;;  %v228_v41 = vmax.f32 %v1268_v35, 0.0  ;;  %v226_v44 = vmax.f32 %v1270_v36, 0.0  ;;  %v340_v31 = vld [vmem:[#allocation2 + $0x370] sm:$0xff]  ;;  %v289_v32 = vld [vmem:[#allocation2 + $0x1d8] sm:$0xff]  ;;  %v286_v38 = vld [vmem:[#allocation2 + $0x1c0] sm:$0xff] }
  0xdc   :  { %v337_v37 = vld [vmem:[#allocation2 + $0x358] sm:$0xff]  ;;  %v753_v36 = vld [vmem:[%s1463_s5 + $0xe8] sm:$0xff] }
  0xdd   :  { %v227_v42 = vmax.f32 %v153_v39, 0.0  ;;  %v229_v43 = vmax.f32 %v224_v40, 0.0  ;;  %v382_v39 = vld [vmem:[#allocation2 + $0x4c0] sm:$0xff]  ;;  %v737_v35 = vld [vmem:[%s1463_s5 + $0x68] sm:$0xff] }
  0xde   :  { %v238_v40 = vld [vmem:[#allocation2 + $0x40] sm:$0xff] }
  0xdf   :  { %503 = vmatprep.mubr.f32.mxu0 %v227_v42  ;;  %574 = vmatprep.mubr.f32.mxu1 %v229_v43 }
  0xe0   :  { %504 = vmatmul.mubr.f32.vlgmr.msra.gmra.mxu0 %v226_v44  ;;  %575 = vmatmul.mubr.f32.vlgmr.msra.gmra.mxu1 %v228_v41 }
  0xe1   :  { %943 = vmatpush3.msra.mxu0 %v277_v45  ;;  %978 = vmatpush3.msra.mxu1 %v373_v46  ;;  %v379_v45 = vld [vmem:[#allocation2 + $0x4a8] sm:$0xff] }
  0xe2   :  { %944 = vmatprep.subr.mxu0 %v322_v47  ;;  %645 = vmatprep.mubr.f32.mxu0 %v227_v42  ;;  %v334_v42 = vld [vmem:[#allocation2 + $0x340] sm:$0xff]  ;;  %v235_v46 = vld [vmem:[#allocation2 + $0x28] sm:$0xff] }
  0xe3   :  { %979 = vmatprep.subr.mxu1 %v418_v48  ;;  %715 = vmatprep.mubr.f32.mxu1 %v229_v43  ;;  %v283_v43 = vld [vmem:[#allocation2 + $0x1a8] sm:$0xff]  ;;  %v280_v48 = vld [vmem:[#allocation2 + $0x190] sm:$0xff] }
  0xe4   :  { %945 = vmatpush3.msra.mxu0 %v274_v49  ;;  %980 = vmatpush3.msra.mxu1 %v370_v50  ;;  %v331_v47 = vld [vmem:[#allocation2 + $0x328] sm:$0xff]  ;;  %v376_v49 = vld [vmem:[#allocation2 + $0x490] sm:$0xff] }
  0xe5   :  { %946 = vmatprep.subr.mxu0 %v319_v51  ;;  %981 = vmatprep.subr.mxu1 %v415_v52  ;;  %v232_v50 = vld [vmem:[#allocation2 + $0x10] sm:$0xff]  ;;  %v755_v52 = vld [vmem:[%s1463_s5 + $0xf8] sm:$0xff] }
  0xe6   :  { %947 = vmatpush3.msra.mxu0 %v271_v53  ;;  %982 = vmatpush3.msra.mxu1 %v367_v54  ;;  %v328_v51 = vld [vmem:[#allocation2 + $0x310] sm:$0xff]  ;;  %v739_v53 = vld [vmem:[%s1463_s5 + $0x78] sm:$0xff] }
  0xe7   :  { %948 = vmatprep.subr.mxu0 %v316_v55  ;;  %983 = vmatprep.subr.mxu1 %v412_v56  ;;  %v754_v54 = vld [vmem:[%s1463_s5 + $0xf0] sm:$0xff]  ;;  %v751_v56 = vld [vmem:[%s1463_s5 + $0xd8] sm:$0xff] }
  0xe8   :  { %949 = vmatpush3.msra.mxu0 %v268_v57  ;;  %984 = vmatpush3.msra.mxu1 %v364_v58  ;;  %v738_v55 = vld [vmem:[%s1463_s5 + $0x70] sm:$0xff]  ;;  %v735_v57 = vld [vmem:[%s1463_s5 + $0x58] sm:$0xff] }
  0xe9   :  { %950 = vmatprep.subr.mxu0 %v313_v59  ;;  %985 = vmatprep.subr.mxu1 %v409_v60  ;;  %v750_v58 = vld [vmem:[%s1463_s5 + $0xd0] sm:$0xff]  ;;  %v749_v60 = vld [vmem:[%s1463_s5 + $0xc8] sm:$0xff] }
  0xea   :  { %951 = vmatpush3.msra.mxu0 %v265_v61  ;;  %986 = vmatpush3.msra.mxu1 %v361_v62  ;;  %v734_v59 = vld [vmem:[%s1463_s5 + $0x50] sm:$0xff]  ;;  %v733_v61 = vld [vmem:[%s1463_s5 + $0x48] sm:$0xff]  ;;  %v748_v62 = vld [vmem:[%s1463_s5 + $0xc0] sm:$0xff] }
  0xeb   :  { %952 = vmatprep.subr.mxu0 %v310_v63  ;;  %987 = vmatprep.subr.mxu1 %v406_v1  ;;  %v732_v63 = vld [vmem:[%s1463_s5 + $0x40] sm:$0xff]  ;;  %v747_v1 = vld [vmem:[%s1463_s5 + $0xb8] sm:$0xff] }
  0xec   :  { %953 = vmatpush3.msra.mxu0 %v262_v2  ;;  %988 = vmatpush3.msra.mxu1 %v358_v3  ;;  %v731_v2 = vld [vmem:[%s1463_s5 + $0x38] sm:$0xff]  ;;  %v746_v3 = vld [vmem:[%s1463_s5 + $0xb0] sm:$0xff] }
  0xed   :  { %954 = vmatprep.subr.mxu0 %v307_v4  ;;  %989 = vmatprep.subr.mxu1 %v403_v5  ;;  %v730_v4 = vld [vmem:[%s1463_s5 + $0x30] sm:$0xff]  ;;  %v745_v5 = vld [vmem:[%s1463_s5 + $0xa8] sm:$0xff] }
  0xee   :  { %955 = vmatpush3.msra.mxu0 %v259_v6  ;;  %990 = vmatpush3.msra.mxu1 %v355_v7  ;;  %v729_v6 = vld [vmem:[%s1463_s5 + $0x28] sm:$0xff]  ;;  %v744_v7 = vld [vmem:[%s1463_s5 + $0xa0] sm:$0xff] }
  0xef   :  { %956 = vmatprep.subr.mxu0 %v304_v8  ;;  %991 = vmatprep.subr.mxu1 %v400_v9  ;;  %v728_v8 = vld [vmem:[%s1463_s5 + $0x20] sm:$0xff]  ;;  %v743_v9 = vld [vmem:[%s1463_s5 + $0x98] sm:$0xff] }
  0xf0   :  { %957 = vmatpush3.msra.mxu0 %v256_v10  ;;  %992 = vmatpush3.msra.mxu1 %v352_v11  ;;  %v727_v10 = vld [vmem:[%s1463_s5 + $0x18] sm:$0xff]  ;;  %v742_v11 = vld [vmem:[%s1463_s5 + $0x90] sm:$0xff] }
  0xf1   :  { %958 = vmatprep.subr.mxu0 %v301_v12  ;;  %993 = vmatprep.subr.mxu1 %v397_v13  ;;  %v726_v12 = vld [vmem:[%s1463_s5 + $0x10] sm:$0xff]  ;;  %v741_v13 = vld [vmem:[%s1463_s5 + $0x88] sm:$0xff] }
  0xf2   :  { %959 = vmatpush3.msra.mxu0 %v253_v14  ;;  %994 = vmatpush3.msra.mxu1 %v349_v15  ;;  %v725_v14 = vld [vmem:[%s1463_s5 + $0x8] sm:$0xff]  ;;  %v740_v15 = vld [vmem:[%s1463_s5 + $0x80] sm:$0xff] }
  0xf3   :  { %960 = vmatprep.subr.mxu0 %v298_v16  ;;  %995 = vmatprep.subr.mxu1 %v394_v17  ;;  %v724_v16 = vld [vmem:[%s1463_s5] sm:$0xff]  ;;  %v771_v17 = vld [vmem:[%s1463_s5 + $0x178] sm:$0xff] }
  0xf4   :  { %961 = vmatpush3.msra.mxu0 %v250_v18  ;;  %996 = vmatpush3.msra.mxu1 %v346_v19  ;;  %v770_v18 = vld [vmem:[%s1463_s5 + $0x170] sm:$0xff]  ;;  %v769_v19 = vld [vmem:[%s1463_s5 + $0x168] sm:$0xff] }
  0xf5   :  { %962 = vmatprep.subr.mxu0 %v295_v20  ;;  %997 = vmatprep.subr.mxu1 %v391_v21  ;;  %v768_v20 = vld [vmem:[%s1463_s5 + $0x160] sm:$0xff]  ;;  %v767_v21 = vld [vmem:[%s1463_s5 + $0x158] sm:$0xff] }
  0xf6   :  { %963 = vmatpush3.msra.mxu0 %v247_v22  ;;  %998 = vmatpush3.msra.mxu1 %v343_v26  ;;  %v766_v22 = vld [vmem:[%s1463_s5 + $0x150] sm:$0xff]  ;;  %v765_v26 = vld [vmem:[%s1463_s5 + $0x148] sm:$0xff] }
  0xf7   :  { %964 = vmatprep.subr.mxu0 %v292_v28  ;;  %999 = vmatprep.subr.mxu1 %v388_v29  ;;  %v764_v28 = vld [vmem:[%s1463_s5 + $0x140] sm:$0xff]  ;;  %v763_v29 = vld [vmem:[%s1463_s5 + $0x138] sm:$0xff] }
  0xf8   :  { %965 = vmatpush3.msra.mxu0 %v244_v30  ;;  %1000 = vmatpush3.msra.mxu1 %v340_v31  ;;  %v762_v30 = vld [vmem:[%s1463_s5 + $0x130] sm:$0xff]  ;;  %v761_v31 = vld [vmem:[%s1463_s5 + $0x128] sm:$0xff] }
  0xf9   :  { %966 = vmatprep.subr.mxu0 %v289_v32  ;;  %1001 = vmatprep.subr.mxu1 %v385_v33  ;;  %v760_v32 = vld [vmem:[%s1463_s5 + $0x120] sm:$0xff]  ;;  %v759_v33 = vld [vmem:[%s1463_s5 + $0x118] sm:$0xff] }
  0xfa   :  { %967 = vmatpush3.msra.mxu0 %v241_v34  ;;  %1002 = vmatpush3.msra.mxu1 %v337_v37  ;;  %v758_v34 = vld [vmem:[%s1463_s5 + $0x110] sm:$0xff]  ;;  %v757_v37 = vld [vmem:[%s1463_s5 + $0x108] sm:$0xff] }
  0xfb   :  { %968 = vmatprep.subr.mxu0 %v286_v38  ;;  %1003 = vmatprep.subr.mxu1 %v382_v39  ;;  %v756_v38 = vld [vmem:[%s1463_s5 + $0x100] sm:$0xff] }
  0xfc   :  { %969 = vmatpush3.msra.mxu0 %v238_v40  ;;  %1004 = vmatpush3.msra.mxu1 %v334_v42  ;;  %v422_v39 = vld [vmem:[%s1462_s4] sm:$0x7] }
  0xfd   :  { %970 = vmatprep.subr.mxu0 %v283_v43  ;;  %1005 = vmatprep.subr.mxu1 %v379_v45  ;;  %v427_v40 = vrot.slane %v422_v39, %v62_v25  ;;  %v431_v42 = vrot.slane %v422_v39, %v66_v27  ;;  %v435_v25 = vrot.slane %v422_v39, %v70_v24 }
  0xfe   :  { %971 = vmatpush3.msra.mxu0 %v235_v46  ;;  %1006 = vmatpush3.msra.mxu1 %v331_v47 }
  0xff   :  { %972 = vmatprep.subr.mxu0 %v280_v48  ;;  %1007 = vmatprep.subr.mxu1 %v376_v49 }
 0x100   :  { %973 = vmatpush3.msra.mxu0 %v232_v50  ;;  %1008 = vmatpush3.msra.mxu1 %v328_v51 }
 0x101   :  { %646 = vmatmul.mubr.f32.vlgmr.msra.gmra.mxu0 %v226_v44  ;;  %716 = vmatmul.mubr.f32.vlgmr.msra.gmra.mxu1 %v228_v41  ;;  %v752_v41 = vld [vmem:[%s1463_s5 + $0xe0] sm:$0xff] }
 0x102   :  { %1012 = vmatprep.subr.mxu0 %v755_v52  ;;  %1064 = vmatprep.subr.mxu1 %v1154_v0  ;;  %v736_v44 = vld [vmem:[%s1463_s5 + $0x60] sm:$0xff] }
 0x103   :  { %1013 = vmatpush3.msra.mxu0 %v739_v53  ;;  %1065 = vmatpush3.msra.mxu1 %v771_v17 }
 0x104   :  { %1014 = vmatprep.subr.mxu0 %v754_v54  ;;  %1066 = vmatprep.subr.mxu1 %v1154_v0 }
 0x105   :  { %1015 = vmatpush3.msra.mxu0 %v738_v55  ;;  %1067 = vmatpush3.msra.mxu1 %v770_v18 }
 0x106   :  { %1016 = vmatprep.subr.mxu0 %v753_v36  ;;  %1068 = vmatprep.subr.mxu1 %v1154_v0 }
 0x107   :  { %1017 = vmatpush3.msra.mxu0 %v737_v35  ;;  %1069 = vmatpush3.msra.mxu1 %v769_v19 }
 0x108   :  { %1018 = vmatprep.subr.mxu0 %v752_v41  ;;  %1070 = vmatprep.subr.mxu1 %v1154_v0 }
 0x109   :  { %1019 = vmatpush3.msra.mxu0 %v736_v44  ;;  %1071 = vmatpush3.msra.mxu1 %v768_v20 }
 0x10a   :  { %1020 = vmatprep.subr.mxu0 %v751_v56  ;;  %1072 = vmatprep.subr.mxu1 %v1154_v0 }
 0x10b   :  { %1021 = vmatpush3.msra.mxu0 %v735_v57  ;;  %1073 = vmatpush3.msra.mxu1 %v767_v21 }
 0x10c   :  { %1022 = vmatprep.subr.mxu0 %v750_v58  ;;  %1074 = vmatprep.subr.mxu1 %v1154_v0 }
 0x10d   :  { %1023 = vmatpush3.msra.mxu0 %v734_v59  ;;  %1075 = vmatpush3.msra.mxu1 %v766_v22 }
 0x10e   :  { %1024 = vmatprep.subr.mxu0 %v749_v60  ;;  %1076 = vmatprep.subr.mxu1 %v1154_v0  ;;  %v941_v60 = vld [vmem:[%s1464_s6] ss:$0 sm:$0xff] }
 0x10f   :  { %1025 = vmatpush3.msra.mxu0 %v733_v61  ;;  %1077 = vmatpush3.msra.mxu1 %v765_v26 }
 0x110   :  { %1026 = vmatprep.subr.mxu0 %v748_v62  ;;  %1078 = vmatprep.subr.mxu1 %v1154_v0 }
 0x111   :  { %1027 = vmatpush3.msra.mxu0 %v732_v63  ;;  %1079 = vmatpush3.msra.mxu1 %v764_v28 }
 0x112   :  { %1028 = vmatprep.subr.mxu0 %v747_v1  ;;  %1080 = vmatprep.subr.mxu1 %v1154_v0 }
 0x113   :  { %1029 = vmatpush3.msra.mxu0 %v731_v2  ;;  %1081 = vmatpush3.msra.mxu1 %v763_v29 }
 0x114   :  { %1030 = vmatprep.subr.mxu0 %v746_v3  ;;  %1082 = vmatprep.subr.mxu1 %v1154_v0 }
 0x115   :  { %1031 = vmatpush3.msra.mxu0 %v730_v4  ;;  %1083 = vmatpush3.msra.mxu1 %v762_v30 }
 0x116   :  { %1032 = vmatprep.subr.mxu0 %v745_v5  ;;  %1084 = vmatprep.subr.mxu1 %v1154_v0 }
 0x117   :  { %1033 = vmatpush3.msra.mxu0 %v729_v6  ;;  %1085 = vmatpush3.msra.mxu1 %v761_v31 }
 0x118   :  { %1034 = vmatprep.subr.mxu0 %v744_v7  ;;  %1086 = vmatprep.subr.mxu1 %v1154_v0 }
 0x119   :  { %1035 = vmatpush3.msra.mxu0 %v728_v8  ;;  %1087 = vmatpush3.msra.mxu1 %v760_v32 }
 0x11a   :  { %1036 = vmatprep.subr.mxu0 %v743_v9  ;;  %1088 = vmatprep.subr.mxu1 %v1154_v0 }
 0x11b   :  { %1037 = vmatpush3.msra.mxu0 %v727_v10  ;;  %1089 = vmatpush3.msra.mxu1 %v759_v33 }
 0x11c   :  { %1038 = vmatprep.subr.mxu0 %v742_v11  ;;  %1090 = vmatprep.subr.mxu1 %v1154_v0 }
 0x11d   :  { %1039 = vmatpush3.msra.mxu0 %v726_v12  ;;  %1091 = vmatpush3.msra.mxu1 %v758_v34 }
 0x11e   :  { %1040 = vmatprep.subr.mxu0 %v741_v13  ;;  %1092 = vmatprep.subr.mxu1 %v1154_v0 }
 0x11f   :  { %1041 = vmatpush3.msra.mxu0 %v725_v14  ;;  %1093 = vmatpush3.msra.mxu1 %v757_v37 }
 0x120   :  { %1042 = vmatprep.subr.mxu0 %v740_v15  ;;  %1094 = vmatprep.subr.mxu1 %v1154_v0 }
 0x121   :  { %1043 = vmatpush3.msra.mxu0 %v724_v16  ;;  %1095 = vmatpush3.msra.mxu1 %v756_v38 }
 0x122   :  { %1096 = vmatprep.mubr.msk.f32.mxu1 %vm1155_vm1, %v1154_v0 }
 0x1a0   :  { %v505_v43 = vpop.f32.mrf.mxu0  ;;  %v576_v45 = vpop.f32.mrf.mxu1 }
 0x1a1   :  { %v506_v46 = vadd.f32 %v505_v43, %v427_v40 }
 0x1a2   :  { %v507_v47 = vpop.f32.mrf.mxu0  ;;  %v578_v50 = vpop.f32.mrf.mxu1 }
 0x1a3   :  { %v508_v48 = vadd.f32 %v507_v47, %v431_v42  ;;  %v577_v49 = vadd.f32 %v576_v45, %v506_v46 }
 0x1a5   :  { %v579_v51 = vadd.f32 %v578_v50, %v508_v48  ;;  %v721_v0 = vmax.f32 %v577_v49, 0.0 }
 0x1a7   :  { %v722_v52 = vmax.f32 %v579_v51, 0.0 }
 0x1a9   :  { %843 = vmatprep.mubr.f32.mxu0 %v722_v52 }
 0x1aa   :  { %844 = vmatmul.mubr.f32.vlgmr.msra.gmra.mxu0 %v721_v0 }
 0x1c1   :  { %v974_v53 = vpop.f32.mrf.mxu0  ;;  %v1009_v54 = vpop.f32.mrf.mxu1 }
 0x1c3   :  { %v975_v55 = vpop.f32.mrf.mxu0  ;;  %v1010_v36 = vpop.f32.mrf.mxu1 }
 0x1c4   :  { %v976_v27 = vadd.f32 %v975_v55, %v974_v53  ;;  %v1011_v41 = vadd.f32 %v1010_v36, %v1009_v54 }
 0x1c6   :  { %v648_v35 = vadd.f32 %v976_v27, %v435_v25 }
 0x1c8   :  { %v718_v44 = vadd.f32 %v1011_v41, %v648_v35 }
 0x1ca   :  { %v723_v56 = vmax.f32 %v718_v44, 0.0 }
 0x1cc   :  { %1097 = vmatmul.mubr.f32.vlgmr.msra.gmra.mxu1 %v723_v56 }
 0x26a   :  { %v1044_v57 = vpop.f32.mrf.mxu0 }
 0x26c   :  { %v1045_v58 = vpop.f32.mrf.mxu0 }
 0x26d   :  { %v1046_v59 = vadd.f32 %v1045_v58, %v1044_v57 }
 0x26f   :  { %v846_v61 = vadd.f32 %v1046_v59, %v941_v60 }
 0x28c   :  { %v915_v62 = vpop.f32.mrf.mxu1 }
 0x28d   :  { %v916_v63 = vadd.f32 %v915_v62, %v846_v61 }
 0x28e   :  { %v1098_v23 = vpop.f32.mrf.mxu1 }
 0x28f   :  { %1105 = vtanh.f32 %v916_v63 }
 0x29c   :  { %v1106_v24 = vpop.eup %1105 }
 0x29d   :  { %v920_v1 = vmul.f32 0.5, %v1106_v24 }
 0x29f   :  { %v921_v2 = vadd.f32 1.0, %v920_v1 }
 0x2a1   :  { %923 = vst.msk [vmem:[#allocation5] sm:$0xff] %vm922_vm2, %v921_v2 }
 0x2a2   :  { %1138 = shalt.err (!%p1135_p9)
}
 0x2a3   :  { %933 = dma.vmem_to_hbm [thread:$0]  %s931_s11, 128, %s1465_s7, [#allocation4]  }
 0x2a4   :  { %1149 = dma.done.wait [#allocation4], 128  }
 0x2a5   :  { %1150 = vsyncadd [#allocation4], 4294967168 }
 0x2a6   :  { %937 = vsyncpa [#allocation3], 1 }
 0x2a7   :  { %938 = vsyncpa [#allocation4], 1 }

// kernel: tpu_custom_call.1
= control target key start
LH: loop header
LB: loop body
LE: loop exit
PB: predicated region body
PF: predicated region fallthrough
CT: control target
= control target key end

     0   :  { %12 = vsyncpa [#allocation3], 0  ;;  %s1458_s0 = inlined_call_operand.vmem [shape: f32[8,32], index: 0, kind: input, shape index: {}]   ;;  %s1459_s1 = inlined_call_operand.vmem [shape: f32[32,512], index: 1, kind: input, shape index: {}]   ;;  %s1460_s2 = inlined_call_operand.vmem [shape: f32[1,512], index: 2, kind: input, shape index: {}]   ;;  %s1461_s3 = inlined_call_operand.hbm [shape: f32[512,384], index: 3, kind: input, shape index: {}]   ;;  %s1462_s4 = inlined_call_operand.vmem [shape: f32[1,384], index: 4, kind: input, shape index: {}]   ;;  %s1463_s5 = inlined_call_operand.vmem [shape: f32[384,8], index: 5, kind: input, shape index: {}]   ;;  %s1464_s6 = inlined_call_operand.vmem [shape: f32[1,8], index: 6, kind: input, shape index: {}]   ;;  %s1465_s7 = inlined_call_operand.hbm [shape: f32[8,8], index: 7, kind: output, shape index: {}]  }
   0x1   :  { %13 = vsyncpa [#allocation4], 0  ;;  %s1151_s24 = smov [#allocation2]  }
   0x2   :  { %s25_s25 = sshll.u32 %s1151_s24, 4  ;;  %s26_s25 = int_to_ptr.vmem [resolvable:$true] %s25_s25 }
   0x3   :  { %s1115_s26 = scalar_lea.vmem %s26_s25, 24576  ;;  %p1120_p1 = scmp.lt.s32.totalorder %s26_s25, %s26_s25 }
   0x4   :  { %p1116_p0 = scmp.ne.s32.totalorder %s26_s25, %s1115_s26  ;;  %p1121_p2 = scmp.lt.s32.totalorder %s1115_s26, %s1115_s26 }
   0x6   :  { %p1122_p3 = por %p1121_p2, %p1120_p1 }
   0x8   :  { %p1123_p4 = pnand %p1122_p3, %p1116_p0 }
   0xa   :  { %1126 = shalt.err (!%p1123_p4)
}
   0xb   :  { %s1152_s27 = smov 384   ;;  %s1153_s28 = smov 24  }
   0xc   :  { %31 = dma.hbm_to_vmem [thread:$0]  %s1461_s3, 24576, %s26_s25, [#allocation3], %s1152_s27, %s1152_s27, %s1153_s28  }
   0xd   :  { %1147 = dma.done.wait [#allocation3], 24576  }
   0xe   :  { %1148 = vsyncadd [#allocation3], 4294942720  ;;  %v1154_v0 = vmov 0.0   ;;  %v55_v1 = vld [vmem:[%s1459_s1 + $0x68] sm:$0xff]  ;;  %v57_v2 = vld [vmem:[%s1459_s1 + $0x78] sm:$0xff]  ;;  %vm80_vm0 = vcmask 261120  }
   0xf   :  { %148 = vmatprep.mubr.f32.mxu0 %v1154_v0  ;;  %219 = vmatprep.mubr.f32.mxu1 %v1154_v0  ;;  %v54_v3 = vld [vmem:[%s1459_s1 + $0x60] sm:$0xff]  ;;  %v56_v4 = vld [vmem:[%s1459_s1 + $0x70] sm:$0xff]  ;;  %v51_v5 = vld [vmem:[%s1459_s1 + $0x48] sm:$0xff]  ;;  %vm1155_vm1 = vmmov 0   ;;  %s1156_s10 = smov [#allocation5]   ;;  %vm922_vm2 = vcmask 64512  }
  0x10   :  { %108 = vmatprep.subr.mxu0 %v55_v1  ;;  %179 = vmatprep.subr.mxu1 %v57_v2  ;;  %v53_v6 = vld [vmem:[%s1459_s1 + $0x58] sm:$0xff]  ;;  %v50_v7 = vld [vmem:[%s1459_s1 + $0x40] sm:$0xff]  ;;  %v52_v8 = vld [vmem:[%s1459_s1 + $0x50] sm:$0xff]  ;;  %s930_s11 = sshll.u32 %s1156_s10, 4  ;;  %s931_s11 = int_to_ptr.vmem [resolvable:$true] %s930_s11 }
  0x11   :  { %109 = vmatpush1.msra.mxu0 %v54_v3  ;;  %180 = vmatpush1.msra.mxu1 %v56_v4  ;;  %v47_v9 = vld [vmem:[%s1459_s1 + $0x28] sm:$0xff]  ;;  %v49_v10 = vld [vmem:[%s1459_s1 + $0x38] sm:$0xff]  ;;  %v46_v11 = vld [vmem:[%s1459_s1 + $0x20] sm:$0xff]  ;;  %s1127_s12 = scalar_lea.vmem %s931_s11, 128  ;;  %p1132_p6 = scmp.lt.s32.totalorder %s931_s11, %s931_s11 }
  0x12   :  { %110 = vmatprep.subr.mxu0 %v51_v5  ;;  %181 = vmatprep.subr.mxu1 %v53_v6  ;;  %v48_v12 = vld [vmem:[%s1459_s1 + $0x30] sm:$0xff]  ;;  %v43_v13 = vld [vmem:[%s1459_s1 + $0x8] sm:$0xff]  ;;  %v45_v14 = vld [vmem:[%s1459_s1 + $0x18] sm:$0xff]  ;;  %p1128_p5 = scmp.ne.s32.totalorder %s931_s11, %s1127_s12  ;;  %p1133_p7 = scmp.lt.s32.totalorder %s1127_s12, %s1127_s12 }
  0x13   :  { %111 = vmatpush1.msra.mxu0 %v50_v7  ;;  %182 = vmatpush1.msra.mxu1 %v52_v8  ;;  %v42_v15 = vld [vmem:[%s1459_s1] sm:$0xff]  ;;  %v44_v16 = vld [vmem:[%s1459_s1 + $0x10] sm:$0xff]  ;;  %v275_v20 = vld [vmem:[#allocation2 + $0x168] sm:$0xff] }
  0x14   :  { %112 = vmatprep.subr.mxu0 %v47_v9  ;;  %183 = vmatprep.subr.mxu1 %v49_v10  ;;  %v41_v17 = vld [vmem:[%s1458_s0] sm:$0xff]  ;;  %v276_v18 = vld [vmem:[#allocation2 + $0x170] sm:$0xff]  ;;  %v371_v21 = vld [vmem:[#allocation2 + $0x468] sm:$0xff]  ;;  %p1134_p8 = por %p1133_p7, %p1132_p6 }
  0x15   :  { %113 = vmatpush1.msra.mxu0 %v46_v11  ;;  %184 = vmatpush1.msra.mxu1 %v48_v12  ;;  %v372_v19 = vld [vmem:[#allocation2 + $0x470] sm:$0xff]  ;;  %v273_v22 = vld [vmem:[#allocation2 + $0x158] sm:$0xff]  ;;  %v270_v26 = vld [vmem:[#allocation2 + $0x140] sm:$0xff] }
  0x16   :  { %114 = vmatprep.subr.mxu0 %v43_v13  ;;  %185 = vmatprep.subr.mxu1 %v45_v14  ;;  %v369_v23 = vld [vmem:[#allocation2 + $0x458] sm:$0xff]  ;;  %v272_v24 = vld [vmem:[#allocation2 + $0x150] sm:$0xff]  ;;  %v366_v27 = vld [vmem:[#allocation2 + $0x440] sm:$0xff]  ;;  %p1135_p9 = pnand %p1134_p8, %p1128_p5 }
  0x17   :  { %115 = vmatpush1.msra.mxu0 %v42_v15  ;;  %186 = vmatpush1.msra.mxu1 %v44_v16  ;;  %v368_v25 = vld [vmem:[#allocation2 + $0x450] sm:$0xff]  ;;  %v269_v28 = vld [vmem:[#allocation2 + $0x138] sm:$0xff]  ;;  %v267_v30 = vld [vmem:[#allocation2 + $0x128] sm:$0xff] }
  0x18   :  { %939 = vmatmul.mubr.msk.f32.vlgmr.msra.gmra.mxu0 %vm80_vm0, %v41_v17  ;;  %940 = vmatmul.mubr.msk.f32.vlgmr.msra.gmra.mxu1 %vm80_vm0, %v41_v17  ;;  %v365_v29 = vld [vmem:[#allocation2 + $0x438] sm:$0xff]  ;;  %v363_v31 = vld [vmem:[#allocation2 + $0x428] sm:$0xff]  ;;  %v266_v32 = vld [vmem:[#allocation2 + $0x120] sm:$0xff] }
  0x19   :  { %439 = vmatprep.subr.mxu0 %v276_v18  ;;  %510 = vmatprep.subr.mxu1 %v372_v19  ;;  %v362_v33 = vld [vmem:[#allocation2 + $0x420] sm:$0xff]  ;;  %v264_v34 = vld [vmem:[#allocation2 + $0x110] sm:$0xff]  ;;  %v263_v36 = vld [vmem:[#allocation2 + $0x108] sm:$0xff] }
  0x1a   :  { %440 = vmatpush1.msra.mxu0 %v275_v20  ;;  %511 = vmatpush1.msra.mxu1 %v371_v21  ;;  %v360_v35 = vld [vmem:[#allocation2 + $0x410] sm:$0xff]  ;;  %v359_v37 = vld [vmem:[#allocation2 + $0x408] sm:$0xff]  ;;  %v261_v38 = vld [vmem:[#allocation2 + $0xf8] sm:$0xff] }
  0x1b   :  { %441 = vmatprep.subr.mxu0 %v273_v22  ;;  %512 = vmatprep.subr.mxu1 %v369_v23  ;;  %v357_v39 = vld [vmem:[#allocation2 + $0x3f8] sm:$0xff]  ;;  %v260_v40 = vld [vmem:[#allocation2 + $0xf0] sm:$0xff]  ;;  %v258_v42 = vld [vmem:[#allocation2 + $0xe0] sm:$0xff] }
  0x1c   :  { %442 = vmatpush1.msra.mxu0 %v272_v24  ;;  %513 = vmatpush1.msra.mxu1 %v368_v25  ;;  %v356_v41 = vld [vmem:[#allocation2 + $0x3f0] sm:$0xff]  ;;  %v354_v43 = vld [vmem:[#allocation2 + $0x3e0] sm:$0xff]  ;;  %v257_v44 = vld [vmem:[#allocation2 + $0xd8] sm:$0xff] }
  0x1d   :  { %443 = vmatprep.subr.mxu0 %v270_v26  ;;  %514 = vmatprep.subr.mxu1 %v366_v27  ;;  %v353_v45 = vld [vmem:[#allocation2 + $0x3d8] sm:$0xff]  ;;  %v255_v46 = vld [vmem:[#allocation2 + $0xc8] sm:$0xff]  ;;  %v254_v48 = vld [vmem:[#allocation2 + $0xc0] sm:$0xff] }
  0x1e   :  { %444 = vmatpush1.msra.mxu0 %v269_v28  ;;  %515 = vmatpush1.msra.mxu1 %v365_v29  ;;  %v351_v47 = vld [vmem:[#allocation2 + $0x3c8] sm:$0xff]  ;;  %v350_v49 = vld [vmem:[#allocation2 + $0x3c0] sm:$0xff]  ;;  %v252_v50 = vld [vmem:[#allocation2 + $0xb0] sm:$0xff] }
  0x1f   :  { %445 = vmatprep.subr.mxu0 %v267_v30  ;;  %516 = vmatprep.subr.mxu1 %v363_v31  ;;  %v348_v51 = vld [vmem:[#allocation2 + $0x3b0] sm:$0xff]  ;;  %v251_v52 = vld [vmem:[#allocation2 + $0xa8] sm:$0xff]  ;;  %v249_v54 = vld [vmem:[#allocation2 + $0x98] sm:$0xff] }
  0x20   :  { %446 = vmatpush1.msra.mxu0 %v266_v32  ;;  %517 = vmatpush1.msra.mxu1 %v362_v33  ;;  %v347_v53 = vld [vmem:[#allocation2 + $0x3a8] sm:$0xff]  ;;  %v345_v55 = vld [vmem:[#allocation2 + $0x398] sm:$0xff]  ;;  %v248_v56 = vld [vmem:[#allocation2 + $0x90] sm:$0xff] }
  0x21   :  { %447 = vmatprep.subr.mxu0 %v264_v34  ;;  %518 = vmatprep.subr.mxu1 %v360_v35  ;;  %v344_v57 = vld [vmem:[#allocation2 + $0x390] sm:$0xff]  ;;  %v246_v58 = vld [vmem:[#allocation2 + $0x80] sm:$0xff]  ;;  %v245_v60 = vld [vmem:[#allocation2 + $0x78] sm:$0xff] }
  0x22   :  { %448 = vmatpush1.msra.mxu0 %v263_v36  ;;  %519 = vmatpush1.msra.mxu1 %v359_v37  ;;  %v342_v59 = vld [vmem:[#allocation2 + $0x380] sm:$0xff]  ;;  %v341_v61 = vld [vmem:[#allocation2 + $0x378] sm:$0xff]  ;;  %v243_v62 = vld [vmem:[#allocation2 + $0x68] sm:$0xff] }
  0x23   :  { %449 = vmatprep.subr.mxu0 %v261_v38  ;;  %520 = vmatprep.subr.mxu1 %v357_v39  ;;  %v339_v63 = vld [vmem:[#allocation2 + $0x368] sm:$0xff]  ;;  %v242_v1 = vld [vmem:[#allocation2 + $0x60] sm:$0xff]  ;;  %v240_v3 = vld [vmem:[#allocation2 + $0x50] sm:$0xff] }
  0x24   :  { %450 = vmatpush1.msra.mxu0 %v260_v40  ;;  %521 = vmatpush1.msra.mxu1 %v356_v41  ;;  %v338_v2 = vld [vmem:[#allocation2 + $0x360] sm:$0xff]  ;;  %v336_v4 = vld [vmem:[#allocation2 + $0x350] sm:$0xff]  ;;  %v239_v5 = vld [vmem:[#allocation2 + $0x48] sm:$0xff] }
  0x25   :  { %451 = vmatprep.subr.mxu0 %v258_v42  ;;  %522 = vmatprep.subr.mxu1 %v354_v43  ;;  %v335_v6 = vld [vmem:[#allocation2 + $0x348] sm:$0xff]  ;;  %v237_v7 = vld [vmem:[#allocation2 + $0x38] sm:$0xff]  ;;  %v236_v9 = vld [vmem:[#allocation2 + $0x30] sm:$0xff] }
  0x26   :  { %452 = vmatpush1.msra.mxu0 %v257_v44  ;;  %523 = vmatpush1.msra.mxu1 %v353_v45  ;;  %v333_v8 = vld [vmem:[#allocation2 + $0x338] sm:$0xff]  ;;  %v332_v10 = vld [vmem:[#allocation2 + $0x330] sm:$0xff]  ;;  %v234_v11 = vld [vmem:[#allocation2 + $0x20] sm:$0xff] }
  0x27   :  { %453 = vmatprep.subr.mxu0 %v255_v46  ;;  %524 = vmatprep.subr.mxu1 %v351_v47  ;;  %v330_v12 = vld [vmem:[#allocation2 + $0x320] sm:$0xff]  ;;  %v233_v13 = vld [vmem:[#allocation2 + $0x18] sm:$0xff]  ;;  %v231_v15 = vld [vmem:[#allocation2 + $0x8] sm:$0xff] }
  0x28   :  { %454 = vmatpush1.msra.mxu0 %v254_v48  ;;  %525 = vmatpush1.msra.mxu1 %v350_v49  ;;  %v329_v14 = vld [vmem:[#allocation2 + $0x318] sm:$0xff]  ;;  %v327_v16 = vld [vmem:[#allocation2 + $0x308] sm:$0xff]  ;;  %v230_v17 = vld [vmem:[#allocation2] sm:$0xff] }
  0x29   :  { %455 = vmatprep.subr.mxu0 %v252_v50  ;;  %526 = vmatprep.subr.mxu1 %v348_v51  ;;  %v326_v18 = vld [vmem:[#allocation2 + $0x300] sm:$0xff]  ;;  %v324_v19 = vld [vmem:[#allocation2 + $0x2f0] sm:$0xff]  ;;  %v323_v21 = vld [vmem:[#allocation2 + $0x2e8] sm:$0xff] }
  0x2a   :  { %456 = vmatpush1.msra.mxu0 %v251_v52  ;;  %527 = vmatpush1.msra.mxu1 %v347_v53  ;;  %v420_v20 = vld [vmem:[#allocation2 + $0x5f0] sm:$0xff]  ;;  %v419_v22 = vld [vmem:[#allocation2 + $0x5e8] sm:$0xff]  ;;  %v321_v23 = vld [vmem:[#allocation2 + $0x2d8] sm:$0xff] }
  0x2b   :  { %457 = vmatprep.subr.mxu0 %v249_v54  ;;  %528 = vmatprep.subr.mxu1 %v345_v55  ;;  %v417_v24 = vld [vmem:[#allocation2 + $0x5d8] sm:$0xff]  ;;  %v320_v25 = vld [vmem:[#allocation2 + $0x2d0] sm:$0xff]  ;;  %v318_v27 = vld [vmem:[#allocation2 + $0x2c0] sm:$0xff] }
  0x2c   :  { %458 = vmatpush1.msra.mxu0 %v248_v56  ;;  %529 = vmatpush1.msra.mxu1 %v344_v57  ;;  %v416_v26 = vld [vmem:[#allocation2 + $0x5d0] sm:$0xff]  ;;  %v414_v28 = vld [vmem:[#allocation2 + $0x5c0] sm:$0xff]  ;;  %v317_v29 = vld [vmem:[#allocation2 + $0x2b8] sm:$0xff] }
  0x2d   :  { %459 = vmatprep.subr.mxu0 %v246_v58  ;;  %530 = vmatprep.subr.mxu1 %v342_v59  ;;  %v413_v30 = vld [vmem:[#allocation2 + $0x5b8] sm:$0xff]  ;;  %v315_v31 = vld [vmem:[#allocation2 + $0x2a8] sm:$0xff]  ;;  %v314_v33 = vld [vmem:[#allocation2 + $0x2a0] sm:$0xff] }
  0x2e   :  { %460 = vmatpush1.msra.mxu0 %v245_v60  ;;  %531 = vmatpush1.msra.mxu1 %v341_v61  ;;  %v411_v32 = vld [vmem:[#allocation2 + $0x5a8] sm:$0xff]  ;;  %v410_v34 = vld [vmem:[#allocation2 + $0x5a0] sm:$0xff]  ;;  %v312_v35 = vld [vmem:[#allocation2 + $0x290] sm:$0xff] }
  0x2f   :  { %461 = vmatprep.subr.mxu0 %v243_v62  ;;  %532 = vmatprep.subr.mxu1 %v339_v63  ;;  %v408_v36 = vld [vmem:[#allocation2 + $0x590] sm:$0xff]  ;;  %v311_v37 = vld [vmem:[#allocation2 + $0x288] sm:$0xff]  ;;  %v309_v39 = vld [vmem:[#allocation2 + $0x278] sm:$0xff] }
  0x30   :  { %462 = vmatpush1.msra.mxu0 %v242_v1  ;;  %533 = vmatpush1.msra.mxu1 %v338_v2  ;;  %v407_v38 = vld [vmem:[#allocation2 + $0x588] sm:$0xff]  ;;  %v405_v40 = vld [vmem:[#allocation2 + $0x578] sm:$0xff]  ;;  %v308_v41 = vld [vmem:[#allocation2 + $0x270] sm:$0xff] }
  0x31   :  { %463 = vmatprep.subr.mxu0 %v240_v3  ;;  %534 = vmatprep.subr.mxu1 %v336_v4  ;;  %v404_v42 = vld [vmem:[#allocation2 + $0x570] sm:$0xff]  ;;  %v306_v43 = vld [vmem:[#allocation2 + $0x260] sm:$0xff]  ;;  %v305_v45 = vld [vmem:[#allocation2 + $0x258] sm:$0xff] }
  0x32   :  { %464 = vmatpush1.msra.mxu0 %v239_v5  ;;  %535 = vmatpush1.msra.mxu1 %v335_v6  ;;  %v402_v44 = vld [vmem:[#allocation2 + $0x560] sm:$0xff]  ;;  %v401_v46 = vld [vmem:[#allocation2 + $0x558] sm:$0xff]  ;;  %v303_v47 = vld [vmem:[#allocation2 + $0x248] sm:$0xff] }
  0x33   :  { %465 = vmatprep.subr.mxu0 %v237_v7  ;;  %536 = vmatprep.subr.mxu1 %v333_v8  ;;  %v399_v48 = vld [vmem:[#allocation2 + $0x548] sm:$0xff]  ;;  %v302_v49 = vld [vmem:[#allocation2 + $0x240] sm:$0xff]  ;;  %v300_v51 = vld [vmem:[#allocation2 + $0x230] sm:$0xff] }
  0x34   :  { %466 = vmatpush1.msra.mxu0 %v236_v9  ;;  %537 = vmatpush1.msra.mxu1 %v332_v10  ;;  %v398_v50 = vld [vmem:[#allocation2 + $0x540] sm:$0xff]  ;;  %v396_v52 = vld [vmem:[#allocation2 + $0x530] sm:$0xff]  ;;  %v299_v53 = vld [vmem:[#allocation2 + $0x228] sm:$0xff] }
  0x35   :  { %467 = vmatprep.subr.mxu0 %v234_v11  ;;  %538 = vmatprep.subr.mxu1 %v330_v12  ;;  %v395_v54 = vld [vmem:[#allocation2 + $0x528] sm:$0xff]  ;;  %v297_v55 = vld [vmem:[#allocation2 + $0x218] sm:$0xff]  ;;  %v296_v57 = vld [vmem:[#allocation2 + $0x210] sm:$0xff] }
  0x36   :  { %468 = vmatpush1.msra.mxu0 %v233_v13  ;;  %539 = vmatpush1.msra.mxu1 %v329_v14  ;;  %v393_v56 = vld [vmem:[#allocation2 + $0x518] sm:$0xff]  ;;  %v392_v58 = vld [vmem:[#allocation2 + $0x510] sm:$0xff]  ;;  %v294_v59 = vld [vmem:[#allocation2 + $0x200] sm:$0xff] }
  0x37   :  { %469 = vmatprep.subr.mxu0 %v231_v15  ;;  %540 = vmatprep.subr.mxu1 %v327_v16  ;;  %v390_v60 = vld [vmem:[#allocation2 + $0x500] sm:$0xff]  ;;  %v293_v61 = vld [vmem:[#allocation2 + $0x1f8] sm:$0xff]  ;;  %v291_v63 = vld [vmem:[#allocation2 + $0x1e8] sm:$0xff] }
  0x38   :  { %470 = vmatpush1.msra.mxu0 %v230_v17  ;;  %541 = vmatpush1.msra.mxu1 %v326_v18  ;;  %v389_v62 = vld [vmem:[#allocation2 + $0x4f8] sm:$0xff]  ;;  %v387_v1 = vld [vmem:[#allocation2 + $0x4e8] sm:$0xff]  ;;  %v290_v2 = vld [vmem:[#allocation2 + $0x1e0] sm:$0xff] }
  0x39   :  { %471 = vmatprep.subr.mxu0 %v324_v19  ;;  %542 = vmatprep.subr.mxu1 %v420_v20  ;;  %v386_v3 = vld [vmem:[#allocation2 + $0x4e0] sm:$0xff]  ;;  %v288_v4 = vld [vmem:[#allocation2 + $0x1d0] sm:$0xff]  ;;  %v287_v6 = vld [vmem:[#allocation2 + $0x1c8] sm:$0xff] }
  0x3a   :  { %472 = vmatpush2.msra.mxu0 %v323_v21  ;;  %543 = vmatpush2.msra.mxu1 %v419_v22  ;;  %v384_v5 = vld [vmem:[#allocation2 + $0x4d0] sm:$0xff]  ;;  %v383_v7 = vld [vmem:[#allocation2 + $0x4c8] sm:$0xff]  ;;  %v285_v8 = vld [vmem:[#allocation2 + $0x1b8] sm:$0xff]  ;;  %v60_v22 = vlaneseq }
  0x3b   :  { %473 = vmatprep.subr.mxu0 %v321_v23  ;;  %544 = vmatprep.subr.mxu1 %v417_v24  ;;  %v381_v9 = vld [vmem:[#allocation2 + $0x4b8] sm:$0xff]  ;;  %v284_v10 = vld [vmem:[#allocation2 + $0x1b0] sm:$0xff]  ;;  %v282_v12 = vld [vmem:[#allocation2 + $0x1a0] sm:$0xff] }
  0x3c   :  { %474 = vmatpush2.msra.mxu0 %v320_v25  ;;  %545 = vmatpush2.msra.mxu1 %v416_v26  ;;  %v380_v11 = vld [vmem:[#allocation2 + $0x4b0] sm:$0xff]  ;;  %v378_v13 = vld [vmem:[#allocation2 + $0x4a0] sm:$0xff]  ;;  %v281_v14 = vld [vmem:[#allocation2 + $0x198] sm:$0xff]  ;;  %v1253_v23 = vshrl.u32 %v60_v22, 7 }
  0x3d   :  { %475 = vmatprep.subr.mxu0 %v318_v27  ;;  %546 = vmatprep.subr.mxu1 %v414_v28  ;;  %v377_v15 = vld [vmem:[#allocation2 + $0x498] sm:$0xff]  ;;  %v279_v16 = vld [vmem:[#allocation2 + $0x188] sm:$0xff]  ;;  %v278_v18 = vld [vmem:[#allocation2 + $0x180] sm:$0xff] }
  0x3e   :  { %476 = vmatpush2.msra.mxu0 %v317_v29  ;;  %547 = vmatpush2.msra.mxu1 %v413_v30  ;;  %v375_v17 = vld [vmem:[#allocation2 + $0x488] sm:$0xff]  ;;  %v374_v19 = vld [vmem:[#allocation2 + $0x480] sm:$0xff]  ;;  %v325_v20 = vld [vmem:[#allocation2 + $0x2f8] sm:$0xff]  ;;  %v70_v24 = vsub.s32 2, %v1253_v23  ;;  %v62_v25 = vsub.s32 0, %v1253_v23  ;;  %v66_v27 = vsub.s32 1, %v1253_v23 }
  0x3f   :  { %477 = vmatprep.subr.mxu0 %v315_v31  ;;  %548 = vmatprep.subr.mxu1 %v411_v32  ;;  %v421_v21 = vld [vmem:[#allocation2 + $0x5f8] sm:$0xff]  ;;  %v58_v26 = vld [vmem:[%s1460_s2] sm:$0xf]  ;;  %v74_v28 = vsub.s32 3, %v1253_v23  ;;  %v247_v22 = vld [vmem:[#allocation2 + $0x88] sm:$0xff] }
  0x40   :  { %478 = vmatpush2.msra.mxu0 %v314_v33  ;;  %549 = vmatpush2.msra.mxu1 %v410_v34  ;;  %v71_v29 = vrot.slane %v58_v26, %v70_v24  ;;  %v63_v30 = vrot.slane %v58_v26, %v62_v25  ;;  %v67_v31 = vrot.slane %v58_v26, %v66_v27 }
  0x41   :  { %479 = vmatprep.subr.mxu0 %v312_v35  ;;  %550 = vmatprep.subr.mxu1 %v408_v36  ;;  %v75_v32 = vrot.slane %v58_v26, %v74_v28  ;;  %v343_v26 = vld [vmem:[#allocation2 + $0x388] sm:$0xff]  ;;  %v292_v28 = vld [vmem:[#allocation2 + $0x1f0] sm:$0xff] }
  0x42   :  { %480 = vmatpush2.msra.mxu0 %v311_v37  ;;  %551 = vmatpush2.msra.mxu1 %v407_v38 }
  0x43   :  { %481 = vmatprep.subr.mxu0 %v309_v39  ;;  %552 = vmatprep.subr.mxu1 %v405_v40 }
  0x44   :  { %482 = vmatpush2.msra.mxu0 %v308_v41  ;;  %553 = vmatpush2.msra.mxu1 %v404_v42 }
  0x45   :  { %483 = vmatprep.subr.mxu0 %v306_v43  ;;  %554 = vmatprep.subr.mxu1 %v402_v44 }
  0x46   :  { %484 = vmatpush2.msra.mxu0 %v305_v45  ;;  %555 = vmatpush2.msra.mxu1 %v401_v46  ;;  %v277_v45 = vld [vmem:[#allocation2 + $0x178] sm:$0xff] }
  0x47   :  { %485 = vmatprep.subr.mxu0 %v303_v47  ;;  %556 = vmatprep.subr.mxu1 %v399_v48  ;;  %v373_v46 = vld [vmem:[#allocation2 + $0x478] sm:$0xff]  ;;  %v322_v47 = vld [vmem:[#allocation2 + $0x2e0] sm:$0xff] }
  0x48   :  { %486 = vmatpush2.msra.mxu0 %v302_v49  ;;  %557 = vmatpush2.msra.mxu1 %v398_v50  ;;  %v418_v48 = vld [vmem:[#allocation2 + $0x5e0] sm:$0xff] }
  0x49   :  { %487 = vmatprep.subr.mxu0 %v300_v51  ;;  %558 = vmatprep.subr.mxu1 %v396_v52  ;;  %v274_v49 = vld [vmem:[#allocation2 + $0x160] sm:$0xff]  ;;  %v319_v51 = vld [vmem:[#allocation2 + $0x2c8] sm:$0xff] }
  0x4a   :  { %488 = vmatpush2.msra.mxu0 %v299_v53  ;;  %559 = vmatpush2.msra.mxu1 %v395_v54  ;;  %v370_v50 = vld [vmem:[#allocation2 + $0x460] sm:$0xff]  ;;  %v415_v52 = vld [vmem:[#allocation2 + $0x5c8] sm:$0xff] }
  0x4b   :  { %489 = vmatprep.subr.mxu0 %v297_v55  ;;  %560 = vmatprep.subr.mxu1 %v393_v56  ;;  %v271_v53 = vld [vmem:[#allocation2 + $0x148] sm:$0xff]  ;;  %v316_v55 = vld [vmem:[#allocation2 + $0x2b0] sm:$0xff] }
  0x4c   :  { %490 = vmatpush2.msra.mxu0 %v296_v57  ;;  %561 = vmatpush2.msra.mxu1 %v392_v58  ;;  %v367_v54 = vld [vmem:[#allocation2 + $0x448] sm:$0xff]  ;;  %v412_v56 = vld [vmem:[#allocation2 + $0x5b0] sm:$0xff] }
  0x4d   :  { %491 = vmatprep.subr.mxu0 %v294_v59  ;;  %562 = vmatprep.subr.mxu1 %v390_v60  ;;  %v268_v57 = vld [vmem:[#allocation2 + $0x130] sm:$0xff]  ;;  %v313_v59 = vld [vmem:[#allocation2 + $0x298] sm:$0xff] }
  0x4e   :  { %492 = vmatpush2.msra.mxu0 %v293_v61  ;;  %563 = vmatpush2.msra.mxu1 %v389_v62  ;;  %v364_v58 = vld [vmem:[#allocation2 + $0x430] sm:$0xff]  ;;  %v409_v60 = vld [vmem:[#allocation2 + $0x598] sm:$0xff] }
  0x4f   :  { %493 = vmatprep.subr.mxu0 %v291_v63  ;;  %564 = vmatprep.subr.mxu1 %v387_v1  ;;  %v265_v61 = vld [vmem:[#allocation2 + $0x118] sm:$0xff]  ;;  %v310_v63 = vld [vmem:[#allocation2 + $0x280] sm:$0xff] }
  0x50   :  { %494 = vmatpush2.msra.mxu0 %v290_v2  ;;  %565 = vmatpush2.msra.mxu1 %v386_v3  ;;  %v361_v62 = vld [vmem:[#allocation2 + $0x418] sm:$0xff]  ;;  %v406_v1 = vld [vmem:[#allocation2 + $0x580] sm:$0xff] }
  0x51   :  { %495 = vmatprep.subr.mxu0 %v288_v4  ;;  %566 = vmatprep.subr.mxu1 %v384_v5  ;;  %v262_v2 = vld [vmem:[#allocation2 + $0x100] sm:$0xff]  ;;  %v307_v4 = vld [vmem:[#allocation2 + $0x268] sm:$0xff] }
  0x52   :  { %496 = vmatpush2.msra.mxu0 %v287_v6  ;;  %567 = vmatpush2.msra.mxu1 %v383_v7  ;;  %v358_v3 = vld [vmem:[#allocation2 + $0x400] sm:$0xff]  ;;  %v403_v5 = vld [vmem:[#allocation2 + $0x568] sm:$0xff] }
  0x53   :  { %497 = vmatprep.subr.mxu0 %v285_v8  ;;  %568 = vmatprep.subr.mxu1 %v381_v9  ;;  %v259_v6 = vld [vmem:[#allocation2 + $0xe8] sm:$0xff]  ;;  %v304_v8 = vld [vmem:[#allocation2 + $0x250] sm:$0xff] }
  0x54   :  { %498 = vmatpush2.msra.mxu0 %v284_v10  ;;  %569 = vmatpush2.msra.mxu1 %v380_v11  ;;  %v355_v7 = vld [vmem:[#allocation2 + $0x3e8] sm:$0xff]  ;;  %v400_v9 = vld [vmem:[#allocation2 + $0x550] sm:$0xff] }
  0x55   :  { %499 = vmatprep.subr.mxu0 %v282_v12  ;;  %570 = vmatprep.subr.mxu1 %v378_v13  ;;  %v256_v10 = vld [vmem:[#allocation2 + $0xd0] sm:$0xff]  ;;  %v301_v12 = vld [vmem:[#allocation2 + $0x238] sm:$0xff] }
  0x56   :  { %500 = vmatpush2.msra.mxu0 %v281_v14  ;;  %571 = vmatpush2.msra.mxu1 %v377_v15  ;;  %v352_v11 = vld [vmem:[#allocation2 + $0x3d0] sm:$0xff]  ;;  %v397_v13 = vld [vmem:[#allocation2 + $0x538] sm:$0xff] }
  0x57   :  { %501 = vmatprep.subr.mxu0 %v279_v16  ;;  %572 = vmatprep.subr.mxu1 %v375_v17  ;;  %v253_v14 = vld [vmem:[#allocation2 + $0xb8] sm:$0xff]  ;;  %v298_v16 = vld [vmem:[#allocation2 + $0x220] sm:$0xff] }
  0x58   :  { %502 = vmatpush2.msra.mxu0 %v278_v18  ;;  %573 = vmatpush2.msra.mxu1 %v374_v19  ;;  %v349_v15 = vld [vmem:[#allocation2 + $0x3b8] sm:$0xff]  ;;  %v394_v17 = vld [vmem:[#allocation2 + $0x520] sm:$0xff] }
  0x59   :  { %942 = vmatprep.subr.mxu0 %v325_v20  ;;  %977 = vmatprep.subr.mxu1 %v421_v21  ;;  %v250_v18 = vld [vmem:[#allocation2 + $0xa0] sm:$0xff]  ;;  %v295_v20 = vld [vmem:[#allocation2 + $0x208] sm:$0xff] }
  0x5a   :  { %v346_v19 = vld [vmem:[#allocation2 + $0x3a0] sm:$0xff]  ;;  %v391_v21 = vld [vmem:[#allocation2 + $0x508] sm:$0xff] }
  0xd8   :  { %v150_v33 = vpop.f32.mrf.mxu0  ;;  %v221_v34 = vpop.f32.mrf.mxu1 }
  0xd9   :  { %v1268_v35 = vadd.f32 %v221_v34, %v71_v29  ;;  %v1270_v36 = vadd.f32 %v150_v33, %v63_v30  ;;  %v388_v29 = vld [vmem:[#allocation2 + $0x4f0] sm:$0xff]  ;;  %v385_v33 = vld [vmem:[#allocation2 + $0x4d8] sm:$0xff] }
  0xda   :  { %v152_v37 = vpop.f32.mrf.mxu0  ;;  %v223_v38 = vpop.f32.mrf.mxu1  ;;  %v244_v30 = vld [vmem:[#allocation2 + $0x70] sm:$0xff]  ;;  %v241_v34 = vld [vmem:[#allocation2 + $0x58] sm:$0xff] }
  0xdb   :  { %v153_v39 = vadd.f32 %v152_v37, %v67_v31  ;;  %v224_v40 = vadd.f32 %v223_v38, %v75_v32  ;;  %v228_v41 = vmax.f32 %v1268_v35, 0.0  ;;  %v226_v44 = vmax.f32 %v1270_v36, 0.0  ;;  %v340_v31 = vld [vmem:[#allocation2 + $0x370] sm:$0xff]  ;;  %v289_v32 = vld [vmem:[#allocation2 + $0x1d8] sm:$0xff]  ;;  %v286_v38 = vld [vmem:[#allocation2 + $0x1c0] sm:$0xff] }
  0xdc   :  { %v337_v37 = vld [vmem:[#allocation2 + $0x358] sm:$0xff]  ;;  %v753_v36 = vld [vmem:[%s1463_s5 + $0xe8] sm:$0xff] }
  0xdd   :  { %v227_v42 = vmax.f32 %v153_v39, 0.0  ;;  %v229_v43 = vmax.f32 %v224_v40, 0.0  ;;  %v382_v39 = vld [vmem:[#allocation2 + $0x4c0] sm:$0xff]  ;;  %v737_v35 = vld [vmem:[%s1463_s5 + $0x68] sm:$0xff] }
  0xde   :  { %v238_v40 = vld [vmem:[#allocation2 + $0x40] sm:$0xff] }
  0xdf   :  { %503 = vmatprep.mubr.f32.mxu0 %v227_v42  ;;  %574 = vmatprep.mubr.f32.mxu1 %v229_v43 }
  0xe0   :  { %504 = vmatmul.mubr.f32.vlgmr.msra.gmra.mxu0 %v226_v44  ;;  %575 = vmatmul.mubr.f32.vlgmr.msra.gmra.mxu1 %v228_v41 }
  0xe1   :  { %943 = vmatpush3.msra.mxu0 %v277_v45  ;;  %978 = vmatpush3.msra.mxu1 %v373_v46  ;;  %v379_v45 = vld [vmem:[#allocation2 + $0x4a8] sm:$0xff] }
  0xe2   :  { %944 = vmatprep.subr.mxu0 %v322_v47  ;;  %645 = vmatprep.mubr.f32.mxu0 %v227_v42  ;;  %v334_v42 = vld [vmem:[#allocation2 + $0x340] sm:$0xff]  ;;  %v235_v46 = vld [vmem:[#allocation2 + $0x28] sm:$0xff] }
  0xe3   :  { %979 = vmatprep.subr.mxu1 %v418_v48  ;;  %715 = vmatprep.mubr.f32.mxu1 %v229_v43  ;;  %v283_v43 = vld [vmem:[#allocation2 + $0x1a8] sm:$0xff]  ;;  %v280_v48 = vld [vmem:[#allocation2 + $0x190] sm:$0xff] }
  0xe4   :  { %945 = vmatpush3.msra.mxu0 %v274_v49  ;;  %980 = vmatpush3.msra.mxu1 %v370_v50  ;;  %v331_v47 = vld [vmem:[#allocation2 + $0x328] sm:$0xff]  ;;  %v376_v49 = vld [vmem:[#allocation2 + $0x490] sm:$0xff] }
  0xe5   :  { %946 = vmatprep.subr.mxu0 %v319_v51  ;;  %981 = vmatprep.subr.mxu1 %v415_v52  ;;  %v232_v50 = vld [vmem:[#allocation2 + $0x10] sm:$0xff]  ;;  %v755_v52 = vld [vmem:[%s1463_s5 + $0xf8] sm:$0xff] }
  0xe6   :  { %947 = vmatpush3.msra.mxu0 %v271_v53  ;;  %982 = vmatpush3.msra.mxu1 %v367_v54  ;;  %v328_v51 = vld [vmem:[#allocation2 + $0x310] sm:$0xff]  ;;  %v739_v53 = vld [vmem:[%s1463_s5 + $0x78] sm:$0xff] }
  0xe7   :  { %948 = vmatprep.subr.mxu0 %v316_v55  ;;  %983 = vmatprep.subr.mxu1 %v412_v56  ;;  %v754_v54 = vld [vmem:[%s1463_s5 + $0xf0] sm:$0xff]  ;;  %v751_v56 = vld [vmem:[%s1463_s5 + $0xd8] sm:$0xff] }
  0xe8   :  { %949 = vmatpush3.msra.mxu0 %v268_v57  ;;  %984 = vmatpush3.msra.mxu1 %v364_v58  ;;  %v738_v55 = vld [vmem:[%s1463_s5 + $0x70] sm:$0xff]  ;;  %v735_v57 = vld [vmem:[%s1463_s5 + $0x58] sm:$0xff] }
  0xe9   :  { %950 = vmatprep.subr.mxu0 %v313_v59  ;;  %985 = vmatprep.subr.mxu1 %v409_v60  ;;  %v750_v58 = vld [vmem:[%s1463_s5 + $0xd0] sm:$0xff]  ;;  %v749_v60 = vld [vmem:[%s1463_s5 + $0xc8] sm:$0xff] }
  0xea   :  { %951 = vmatpush3.msra.mxu0 %v265_v61  ;;  %986 = vmatpush3.msra.mxu1 %v361_v62  ;;  %v734_v59 = vld [vmem:[%s1463_s5 + $0x50] sm:$0xff]  ;;  %v733_v61 = vld [vmem:[%s1463_s5 + $0x48] sm:$0xff]  ;;  %v748_v62 = vld [vmem:[%s1463_s5 + $0xc0] sm:$0xff] }
  0xeb   :  { %952 = vmatprep.subr.mxu0 %v310_v63  ;;  %987 = vmatprep.subr.mxu1 %v406_v1  ;;  %v732_v63 = vld [vmem:[%s1463_s5 + $0x40] sm:$0xff]  ;;  %v747_v1 = vld [vmem:[%s1463_s5 + $0xb8] sm:$0xff] }
  0xec   :  { %953 = vmatpush3.msra.mxu0 %v262_v2  ;;  %988 = vmatpush3.msra.mxu1 %v358_v3  ;;  %v731_v2 = vld [vmem:[%s1463_s5 + $0x38] sm:$0xff]  ;;  %v746_v3 = vld [vmem:[%s1463_s5 + $0xb0] sm:$0xff] }
  0xed   :  { %954 = vmatprep.subr.mxu0 %v307_v4  ;;  %989 = vmatprep.subr.mxu1 %v403_v5  ;;  %v730_v4 = vld [vmem:[%s1463_s5 + $0x30] sm:$0xff]  ;;  %v745_v5 = vld [vmem:[%s1463_s5 + $0xa8] sm:$0xff] }
  0xee   :  { %955 = vmatpush3.msra.mxu0 %v259_v6  ;;  %990 = vmatpush3.msra.mxu1 %v355_v7  ;;  %v729_v6 = vld [vmem:[%s1463_s5 + $0x28] sm:$0xff]  ;;  %v744_v7 = vld [vmem:[%s1463_s5 + $0xa0] sm:$0xff] }
  0xef   :  { %956 = vmatprep.subr.mxu0 %v304_v8  ;;  %991 = vmatprep.subr.mxu1 %v400_v9  ;;  %v728_v8 = vld [vmem:[%s1463_s5 + $0x20] sm:$0xff]  ;;  %v743_v9 = vld [vmem:[%s1463_s5 + $0x98] sm:$0xff] }
  0xf0   :  { %957 = vmatpush3.msra.mxu0 %v256_v10  ;;  %992 = vmatpush3.msra.mxu1 %v352_v11  ;;  %v727_v10 = vld [vmem:[%s1463_s5 + $0x18] sm:$0xff]  ;;  %v742_v11 = vld [vmem:[%s1463_s5 + $0x90] sm:$0xff] }
  0xf1   :  { %958 = vmatprep.subr.mxu0 %v301_v12  ;;  %993 = vmatprep.subr.mxu1 %v397_v13  ;;  %v726_v12 = vld [vmem:[%s1463_s5 + $0x10] sm:$0xff]  ;;  %v741_v13 = vld [vmem:[%s1463_s5 + $0x88] sm:$0xff] }
  0xf2   :  { %959 = vmatpush3.msra.mxu0 %v253_v14  ;;  %994 = vmatpush3.msra.mxu1 %v349_v15  ;;  %v725_v14 = vld [vmem:[%s1463_s5 + $0x8] sm:$0xff]  ;;  %v740_v15 = vld [vmem:[%s1463_s5 + $0x80] sm:$0xff] }
  0xf3   :  { %960 = vmatprep.subr.mxu0 %v298_v16  ;;  %995 = vmatprep.subr.mxu1 %v394_v17  ;;  %v724_v16 = vld [vmem:[%s1463_s5] sm:$0xff]  ;;  %v771_v17 = vld [vmem:[%s1463_s5 + $0x178] sm:$0xff] }
  0xf4   :  { %961 = vmatpush3.msra.mxu0 %v250_v18  ;;  %996 = vmatpush3.msra.mxu1 %v346_v19  ;;  %v770_v18 = vld [vmem:[%s1463_s5 + $0x170] sm:$0xff]  ;;  %v769_v19 = vld [vmem:[%s1463_s5 + $0x168] sm:$0xff] }
  0xf5   :  { %962 = vmatprep.subr.mxu0 %v295_v20  ;;  %997 = vmatprep.subr.mxu1 %v391_v21  ;;  %v768_v20 = vld [vmem:[%s1463_s5 + $0x160] sm:$0xff]  ;;  %v767_v21 = vld [vmem:[%s1463_s5 + $0x158] sm:$0xff] }
  0xf6   :  { %963 = vmatpush3.msra.mxu0 %v247_v22  ;;  %998 = vmatpush3.msra.mxu1 %v343_v26  ;;  %v766_v22 = vld [vmem:[%s1463_s5 + $0x150] sm:$0xff]  ;;  %v765_v26 = vld [vmem:[%s1463_s5 + $0x148] sm:$0xff] }
  0xf7   :  { %964 = vmatprep.subr.mxu0 %v292_v28  ;;  %999 = vmatprep.subr.mxu1 %v388_v29  ;;  %v764_v28 = vld [vmem:[%s1463_s5 + $0x140] sm:$0xff]  ;;  %v763_v29 = vld [vmem:[%s1463_s5 + $0x138] sm:$0xff] }
  0xf8   :  { %965 = vmatpush3.msra.mxu0 %v244_v30  ;;  %1000 = vmatpush3.msra.mxu1 %v340_v31  ;;  %v762_v30 = vld [vmem:[%s1463_s5 + $0x130] sm:$0xff]  ;;  %v761_v31 = vld [vmem:[%s1463_s5 + $0x128] sm:$0xff] }
  0xf9   :  { %966 = vmatprep.subr.mxu0 %v289_v32  ;;  %1001 = vmatprep.subr.mxu1 %v385_v33  ;;  %v760_v32 = vld [vmem:[%s1463_s5 + $0x120] sm:$0xff]  ;;  %v759_v33 = vld [vmem:[%s1463_s5 + $0x118] sm:$0xff] }
  0xfa   :  { %967 = vmatpush3.msra.mxu0 %v241_v34  ;;  %1002 = vmatpush3.msra.mxu1 %v337_v37  ;;  %v758_v34 = vld [vmem:[%s1463_s5 + $0x110] sm:$0xff]  ;;  %v757_v37 = vld [vmem:[%s1463_s5 + $0x108] sm:$0xff] }
  0xfb   :  { %968 = vmatprep.subr.mxu0 %v286_v38  ;;  %1003 = vmatprep.subr.mxu1 %v382_v39  ;;  %v756_v38 = vld [vmem:[%s1463_s5 + $0x100] sm:$0xff] }
  0xfc   :  { %969 = vmatpush3.msra.mxu0 %v238_v40  ;;  %1004 = vmatpush3.msra.mxu1 %v334_v42  ;;  %v422_v39 = vld [vmem:[%s1462_s4] sm:$0x7] }
  0xfd   :  { %970 = vmatprep.subr.mxu0 %v283_v43  ;;  %1005 = vmatprep.subr.mxu1 %v379_v45  ;;  %v427_v40 = vrot.slane %v422_v39, %v62_v25  ;;  %v431_v42 = vrot.slane %v422_v39, %v66_v27  ;;  %v435_v25 = vrot.slane %v422_v39, %v70_v24 }
  0xfe   :  { %971 = vmatpush3.msra.mxu0 %v235_v46  ;;  %1006 = vmatpush3.msra.mxu1 %v331_v47 }
  0xff   :  { %972 = vmatprep.subr.mxu0 %v280_v48  ;;  %1007 = vmatprep.subr.mxu1 %v376_v49 }
 0x100   :  { %973 = vmatpush3.msra.mxu0 %v232_v50  ;;  %1008 = vmatpush3.msra.mxu1 %v328_v51 }
 0x101   :  { %646 = vmatmul.mubr.f32.vlgmr.msra.gmra.mxu0 %v226_v44  ;;  %716 = vmatmul.mubr.f32.vlgmr.msra.gmra.mxu1 %v228_v41  ;;  %v752_v41 = vld [vmem:[%s1463_s5 + $0xe0] sm:$0xff] }
 0x102   :  { %1012 = vmatprep.subr.mxu0 %v755_v52  ;;  %1064 = vmatprep.subr.mxu1 %v1154_v0  ;;  %v736_v44 = vld [vmem:[%s1463_s5 + $0x60] sm:$0xff] }
 0x103   :  { %1013 = vmatpush3.msra.mxu0 %v739_v53  ;;  %1065 = vmatpush3.msra.mxu1 %v771_v17 }
 0x104   :  { %1014 = vmatprep.subr.mxu0 %v754_v54  ;;  %1066 = vmatprep.subr.mxu1 %v1154_v0 }
 0x105   :  { %1015 = vmatpush3.msra.mxu0 %v738_v55  ;;  %1067 = vmatpush3.msra.mxu1 %v770_v18 }
 0x106   :  { %1016 = vmatprep.subr.mxu0 %v753_v36  ;;  %1068 = vmatprep.subr.mxu1 %v1154_v0 }
 0x107   :  { %1017 = vmatpush3.msra.mxu0 %v737_v35  ;;  %1069 = vmatpush3.msra.mxu1 %v769_v19 }
 0x108   :  { %1018 = vmatprep.subr.mxu0 %v752_v41  ;;  %1070 = vmatprep.subr.mxu1 %v1154_v0 }
 0x109   :  { %1019 = vmatpush3.msra.mxu0 %v736_v44  ;;  %1071 = vmatpush3.msra.mxu1 %v768_v20 }
 0x10a   :  { %1020 = vmatprep.subr.mxu0 %v751_v56  ;;  %1072 = vmatprep.subr.mxu1 %v1154_v0 }
 0x10b   :  { %1021 = vmatpush3.msra.mxu0 %v735_v57  ;;  %1073 = vmatpush3.msra.mxu1 %v767_v21 }
 0x10c   :  { %1022 = vmatprep.subr.mxu0 %v750_v58  ;;  %1074 = vmatprep.subr.mxu1 %v1154_v0 }
 0x10d   :  { %1023 = vmatpush3.msra.mxu0 %v734_v59  ;;  %1075 = vmatpush3.msra.mxu1 %v766_v22 }
 0x10e   :  { %1024 = vmatprep.subr.mxu0 %v749_v60  ;;  %1076 = vmatprep.subr.mxu1 %v1154_v0  ;;  %v941_v60 = vld [vmem:[%s1464_s6] ss:$0 sm:$0xff] }
 0x10f   :  { %1025 = vmatpush3.msra.mxu0 %v733_v61  ;;  %1077 = vmatpush3.msra.mxu1 %v765_v26 }
 0x110   :  { %1026 = vmatprep.subr.mxu0 %v748_v62  ;;  %1078 = vmatprep.subr.mxu1 %v1154_v0 }
 0x111   :  { %1027 = vmatpush3.msra.mxu0 %v732_v63  ;;  %1079 = vmatpush3.msra.mxu1 %v764_v28 }
 0x112   :  { %1028 = vmatprep.subr.mxu0 %v747_v1  ;;  %1080 = vmatprep.subr.mxu1 %v1154_v0 }
 0x113   :  { %1029 = vmatpush3.msra.mxu0 %v731_v2  ;;  %1081 = vmatpush3.msra.mxu1 %v763_v29 }
 0x114   :  { %1030 = vmatprep.subr.mxu0 %v746_v3  ;;  %1082 = vmatprep.subr.mxu1 %v1154_v0 }
 0x115   :  { %1031 = vmatpush3.msra.mxu0 %v730_v4  ;;  %1083 = vmatpush3.msra.mxu1 %v762_v30 }
 0x116   :  { %1032 = vmatprep.subr.mxu0 %v745_v5  ;;  %1084 = vmatprep.subr.mxu1 %v1154_v0 }
 0x117   :  { %1033 = vmatpush3.msra.mxu0 %v729_v6  ;;  %1085 = vmatpush3.msra.mxu1 %v761_v31 }
 0x118   :  { %1034 = vmatprep.subr.mxu0 %v744_v7  ;;  %1086 = vmatprep.subr.mxu1 %v1154_v0 }
 0x119   :  { %1035 = vmatpush3.msra.mxu0 %v728_v8  ;;  %1087 = vmatpush3.msra.mxu1 %v760_v32 }
 0x11a   :  { %1036 = vmatprep.subr.mxu0 %v743_v9  ;;  %1088 = vmatprep.subr.mxu1 %v1154_v0 }
 0x11b   :  { %1037 = vmatpush3.msra.mxu0 %v727_v10  ;;  %1089 = vmatpush3.msra.mxu1 %v759_v33 }
 0x11c   :  { %1038 = vmatprep.subr.mxu0 %v742_v11  ;;  %1090 = vmatprep.subr.mxu1 %v1154_v0 }
 0x11d   :  { %1039 = vmatpush3.msra.mxu0 %v726_v12  ;;  %1091 = vmatpush3.msra.mxu1 %v758_v34 }
 0x11e   :  { %1040 = vmatprep.subr.mxu0 %v741_v13  ;;  %1092 = vmatprep.subr.mxu1 %v1154_v0 }
 0x11f   :  { %1041 = vmatpush3.msra.mxu0 %v725_v14  ;;  %1093 = vmatpush3.msra.mxu1 %v757_v37 }
 0x120   :  { %1042 = vmatprep.subr.mxu0 %v740_v15  ;;  %1094 = vmatprep.subr.mxu1 %v1154_v0 }
 0x121   :  { %1043 = vmatpush3.msra.mxu0 %v724_v16  ;;  %1095 = vmatpush3.msra.mxu1 %v756_v38 }
 0x122   :  { %1096 = vmatprep.mubr.msk.f32.mxu1 %vm1155_vm1, %v1154_v0 }
 0x1a0   :  { %v505_v43 = vpop.f32.mrf.mxu0  ;;  %v576_v45 = vpop.f32.mrf.mxu1 }
 0x1a1   :  { %v506_v46 = vadd.f32 %v505_v43, %v427_v40 }
 0x1a2   :  { %v507_v47 = vpop.f32.mrf.mxu0  ;;  %v578_v50 = vpop.f32.mrf.mxu1 }
 0x1a3   :  { %v508_v48 = vadd.f32 %v507_v47, %v431_v42  ;;  %v577_v49 = vadd.f32 %v576_v45, %v506_v46 }
 0x1a5   :  { %v579_v51 = vadd.f32 %v578_v50, %v508_v48  ;;  %v721_v0 = vmax.f32 %v577_v49, 0.0 }
 0x1a7   :  { %v722_v52 = vmax.f32 %v579_v51, 0.0 }
 0x1a9   :  { %843 = vmatprep.mubr.f32.mxu0 %v722_v52 }
 0x1aa   :  { %844 = vmatmul.mubr.f32.vlgmr.msra.gmra.mxu0 %v721_v0 }
 0x1c1   :  { %v974_v53 = vpop.f32.mrf.mxu0  ;;  %v1009_v54 = vpop.f32.mrf.mxu1 }
 0x1c3   :  { %v975_v55 = vpop.f32.mrf.mxu0  ;;  %v1010_v36 = vpop.f32.mrf.mxu1 }
 0x1c4   :  { %v976_v27 = vadd.f32 %v975_v55, %v974_v53  ;;  %v1011_v41 = vadd.f32 %v1010_v36, %v1009_v54 }
 0x1c6   :  { %v648_v35 = vadd.f32 %v976_v27, %v435_v25 }
 0x1c8   :  { %v718_v44 = vadd.f32 %v1011_v41, %v648_v35 }
 0x1ca   :  { %v723_v56 = vmax.f32 %v718_v44, 0.0 }
 0x1cc   :  { %1097 = vmatmul.mubr.f32.vlgmr.msra.gmra.mxu1 %v723_v56 }
 0x26a   :  { %v1044_v57 = vpop.f32.mrf.mxu0 }
 0x26c   :  { %v1045_v58 = vpop.f32.mrf.mxu0 }
 0x26d   :  { %v1046_v59 = vadd.f32 %v1045_v58, %v1044_v57 }
 0x26f   :  { %v846_v61 = vadd.f32 %v1046_v59, %v941_v60 }
 0x28c   :  { %v915_v62 = vpop.f32.mrf.mxu1 }
 0x28d   :  { %v916_v63 = vadd.f32 %v915_v62, %v846_v61 }
 0x28e   :  { %v1098_v23 = vpop.f32.mrf.mxu1 }
 0x28f   :  { %1105 = vtanh.f32 %v916_v63 }
 0x29c   :  { %v1106_v24 = vpop.eup %1105 }
 0x29d   :  { %v920_v1 = vmul.f32 0.5, %v1106_v24 }
 0x29f   :  { %v921_v2 = vadd.f32 1.0, %v920_v1 }
 0x2a1   :  { %923 = vst.msk [vmem:[#allocation5] sm:$0xff] %vm922_vm2, %v921_v2 }
 0x2a2   :  { %1138 = shalt.err (!%p1135_p9)
}
 0x2a3   :  { %933 = dma.vmem_to_hbm [thread:$0]  %s931_s11, 128, %s1465_s7, [#allocation4]  }
 0x2a4   :  { %1149 = dma.done.wait [#allocation4], 128  }
 0x2a5   :  { %1150 = vsyncadd [#allocation4], 4294967168 }
 0x2a6   :  { %937 = vsyncpa [#allocation3], 1 }
 0x2a7   :  { %938 = vsyncpa [#allocation4], 1 }

</bundles_post_ra>
